<compile_context>
chip_gen: v7x
topology: tpu7x:2x2x1
jax: 0.10.0
libtpu: 0.0.40
codegen_flags: <defaults>
</compile_context>

<pallas_src>
import jax
import jax.numpy as jnp
from jax.experimental import pallas as pl
from jax.experimental.pallas import tpu as pltpu

# Logical layer sizes from the PyTorch module __init__
DIMS = [100, 256, 512, 1024, 256, 28 * 28]   # last = 784
K_PAD = 128            # latent dim padded 100 -> 128 (aligned contraction)
N_OUT = DIMS[-1]       # 784 — output kept at logical width (no column pad)

# Padded (VMEM) shapes of each layer's weight matrix [in, out]
_PAD_IN = [K_PAD, 256, 512, 1024, 256]
_PAD_OUT = [256, 512, 1024, 256, N_OUT]


def _generator_kernel(x_ref,
                      w1_ref, b1_ref,
                      w2_ref, b2_ref,
                      w3_ref, b3_ref,
                      w4_ref, b4_ref,
                      w5_ref, b5_ref,
                      o_ref):
    """Full 5-layer MLP forward for one batch tile, entirely in VMEM.

    Weights are bf16 (MXU native), accumulation is f32, biases are f32.
    """
    h = x_ref[...].astype(jnp.bfloat16)

    # Linear + ReLU x4 (bf16 MXU matmuls, f32 accumulation)
    h = jnp.dot(h, w1_ref[...], preferred_element_type=jnp.float32) + b1_ref[...]
    h = jnp.maximum(h, 0.0).astype(jnp.bfloat16)
    h = jnp.dot(h, w2_ref[...], preferred_element_type=jnp.float32) + b2_ref[...]
    h = jnp.maximum(h, 0.0).astype(jnp.bfloat16)
    h = jnp.dot(h, w3_ref[...], preferred_element_type=jnp.float32) + b3_ref[...]
    h = jnp.maximum(h, 0.0).astype(jnp.bfloat16)
    h = jnp.dot(h, w4_ref[...], preferred_element_type=jnp.float32) + b4_ref[...]
    h = jnp.maximum(h, 0.0).astype(jnp.bfloat16)

    # Final Linear + Tanh, 784-wide (full last-dim block; only the last partial
    # vreg store per row-group is masked — far cheaper than a post-kernel slice).
    h = jnp.dot(h, w5_ref[...], preferred_element_type=jnp.float32) + b5_ref[...]
    o_ref[...] = jnp.tanh(h).astype(o_ref.dtype)


def _round_up(n, m):
    return ((n + m - 1) // m) * m


def _choose_tm(B):
    """Workload-aware batch tile.

    - Small batches: one tile of round_up(B, 8) (no padding waste).
    - Large batches: 256/512 to amortize per-grid-step overhead while keeping
      n_tiles >= 2 (so v7x's two TensorCores both get work).
    """
    if B < 128:
        return _round_up(max(B, 8), 8)
    if B < 512:
        return 128
    if B < 4096:
        return 256
    return 512


def generator_forward(x, params, *, tm=None, out_dtype=jnp.float32):
    """x: [B, 100] float32 -> [B, 28, 28, 1] (matches PyTorch forward).

    tm=None picks a workload-aware tile (see _choose_tm); override to sweep.
    out_dtype=jnp.bfloat16 halves output HBM writes if the consumer allows it.
    """
    B, Din = x.shape
    assert Din == DIMS[0]

    if tm is None:
        tm = _choose_tm(B)
    n_tiles = pl.cdiv(B, tm)           # python ints -> python int
    Bp = n_tiles * tm

    # Pad batch up to a multiple of tm and features 100 -> 128 (zeros).
    x_p = jnp.pad(x.astype(jnp.float32), ((0, Bp - B), (0, K_PAD - Din)))

    # Grid-invariant specs for weights/biases: DMA'd once, resident in VMEM
    # across all batch tiles.
    def resident_spec(shape):
        return pl.BlockSpec(shape, lambda i: (0, 0))

    in_specs = [pl.BlockSpec((tm, K_PAD), lambda i: (i, 0))]
    flat_params = []
    for (w, b) in params:
        in_specs.append(resident_spec(w.shape))
        in_specs.append(resident_spec(b.shape))
        flat_params.extend([w, b])

    out_spec = pl.BlockSpec((tm, N_OUT), lambda i: (i, 0))

    kernel = pl.pallas_call(
        _generator_kernel,
        out_shape=jax.ShapeDtypeStruct((Bp, N_OUT), out_dtype),
        grid_spec=pltpu.PrefetchScalarGridSpec(
            num_scalar_prefetch=0,
            grid=(n_tiles,),
            in_specs=in_specs,
            out_specs=out_spec,
        ),
        compiler_params=pltpu.CompilerParams(
            dimension_semantics=("parallel",),   # batch tiles shard across TCs
            vmem_limit_bytes=32 << 20,           # safe on v5e/v6e/v7x
        ),
    )
    flat = kernel(x_p, *flat_params)             # [Bp, 784]
    if Bp != B:
        flat = flat[:B]                          # drop batch padding rows only
    return flat.reshape(-1, 28, 28, 1)           # img.view(-1, 28, 28, 1)


def init_params(key):
    """Deterministic init mimicking nn.Linear default (uniform +/- 1/sqrt(fan_in)).

    Weights are stored [in, out] (transposed vs PyTorch's [out, in]) so the
    kernel computes x @ W directly; layer-1 input dim is zero-padded 100->128;
    weights cast to bf16, biases [1, out] stay f32.
    """
    params = []
    for li in range(5):
        fan_in, fan_out = DIMS[li], DIMS[li + 1]          # logical sizes
        pin, pout = _PAD_IN[li], _PAD_OUT[li]             # padded (VMEM) sizes
        key, kw, kb = jax.random.split(key, 3)
        bound = 1.0 / (float(fan_in) ** 0.5)
        w = jax.random.uniform(kw, (fan_in, fan_out), jnp.float32, -bound, bound)
        b = jax.random.uniform(kb, (1, fan_out), jnp.float32, -bound, bound)
        w = jnp.pad(w, ((0, pin - fan_in), (0, pout - fan_out))).astype(jnp.bfloat16)
        b = jnp.pad(b, ((0, 0), (0, pout - fan_out)))     # stays f32
        params.append((w, b))
    return params


def _reference_forward(x, params):
    """Pure-JAX f32 reference of the same padded network (for tolerance check)."""
    h = jnp.pad(x.astype(jnp.float32), ((0, 0), (0, K_PAD - x.shape[1])))
    for li, (w, b) in enumerate(params):
        h = h @ w.astype(jnp.float32) + b
        h = jnp.maximum(h, 0.0) if li < 4 else jnp.tanh(h)
    return h.reshape(-1, 28, 28, 1)


if __name__ == "__main__":
    key = jax.random.PRNGKey(0)
    key, kx = jax.random.split(key)

    params = init_params(key)

    # Small (inference-style) batch: single 8-row tile, no padding waste.
    B = 8
    x = jax.random.normal(kx, (B, 100), dtype=jnp.float32)  # latent noise
    img = jax.block_until_ready(generator_forward(x, params))

    assert img.shape == (B, 28, 28, 1), img.shape
    assert img.dtype == jnp.float32
    assert bool(jnp.all(jnp.abs(img) <= 1.0 + 1e-6))
    assert bool(jnp.all(jnp.isfinite(img)))

    # Mixed-precision (bf16 weights/activations, f32 accumulation) vs f32 ref.
    ref = _reference_forward(x, params)
    max_err = float(jnp.max(jnp.abs(img - ref)))
    assert max_err < 0.1, f"max abs err vs f32 reference: {max_err}"

    # Exercise the multi-tile path (B not a multiple of the tile) too.
    key, kx2 = jax.random.split(key)
    B2 = 130
    x2 = jax.random.normal(kx2, (B2, 100), dtype=jnp.float32)
    img2 = jax.block_until_ready(generator_forward(x2, params))
    assert img2.shape == (B2, 28, 28, 1), img2.shape
    assert bool(jnp.all(jnp.isfinite(img2)))

    print("KERNEL_OK")
</pallas_src>

<mosaic_0001>
module attributes {stable_mosaic.version = 11 : i64} {
  func.func @_generator_kernel(%arg0: i32, %arg1: memref<8x128xf32, #tpu.memory_space<vmem>>, %arg2: memref<128x256xbf16, #tpu.memory_space<vmem>>, %arg3: memref<1x256xf32, #tpu.memory_space<vmem>>, %arg4: memref<256x512xbf16, #tpu.memory_space<vmem>>, %arg5: memref<1x512xf32, #tpu.memory_space<vmem>>, %arg6: memref<512x1024xbf16, #tpu.memory_space<vmem>>, %arg7: memref<1x1024xf32, #tpu.memory_space<vmem>>, %arg8: memref<1024x256xbf16, #tpu.memory_space<vmem>>, %arg9: memref<1x256xf32, #tpu.memory_space<vmem>>, %arg10: memref<256x784xbf16, #tpu.memory_space<vmem>>, %arg11: memref<1x784xf32, #tpu.memory_space<vmem>>, %arg12: memref<8x784xf32, #tpu.memory_space<vmem>>) attributes {dimension_semantics = [#tpu.dimension_semantics<parallel>], iteration_bounds = array<i64: 1>, scalar_prefetch = 0 : i64, scratch_operands = 0 : i64, tpu.core_type = #tpu.core_type<tc>, window_params = [{transform_indices = @transform_0, window_bounds = array<i64: 8, 128>}, {pipeline_mode = #tpu.pipeline_mode<synchronous>, transform_indices = @transform_1, window_bounds = array<i64: 128, 256>}, {pipeline_mode = #tpu.pipeline_mode<synchronous>, transform_indices = @transform_2, window_bounds = array<i64: 1, 256>}, {pipeline_mode = #tpu.pipeline_mode<synchronous>, transform_indices = @transform_3, window_bounds = array<i64: 256, 512>}, {pipeline_mode = #tpu.pipeline_mode<synchronous>, transform_indices = @transform_4, window_bounds = array<i64: 1, 512>}, {pipeline_mode = #tpu.pipeline_mode<synchronous>, transform_indices = @transform_5, window_bounds = array<i64: 512, 1024>}, {pipeline_mode = #tpu.pipeline_mode<synchronous>, transform_indices = @transform_6, window_bounds = array<i64: 1, 1024>}, {pipeline_mode = #tpu.pipeline_mode<synchronous>, transform_indices = @transform_7, window_bounds = array<i64: 1024, 256>}, {pipeline_mode = #tpu.pipeline_mode<synchronous>, transform_indices = @transform_8, window_bounds = array<i64: 1, 256>}, {pipeline_mode = #tpu.pipeline_mode<synchronous>, transform_indices = @transform_9, window_bounds = array<i64: 256, 784>}, {pipeline_mode = #tpu.pipeline_mode<synchronous>, transform_indices = @transform_10, window_bounds = array<i64: 1, 784>}, {transform_indices = @transform_11, window_bounds = array<i64: 8, 784>}]} {
    %c0 = arith.constant 0 : index
    %c0_0 = arith.constant 0 : index
    %0 = vector.load %arg1[%c0, %c0_0] : memref<8x128xf32, #tpu.memory_space<vmem>>, vector<8x128xf32>
    %1 = arith.truncf %0 : vector<8x128xf32> to vector<8x128xbf16>
    %c0_1 = arith.constant 0 : index
    %c0_2 = arith.constant 0 : index
    %2 = vector.load %arg2[%c0_1, %c0_2] : memref<128x256xbf16, #tpu.memory_space<vmem>>, vector<128x256xbf16>
    %cst = arith.constant dense<0.000000e+00> : vector<8x256xf32>
    %3 = tpu.matmul %1, %2, %cst {dimension_numbers = #tpu.dot_dimension_numbers<[1], [0], [0], [1], [0, 0, 1, 1], [], []>} : vector<8x128xbf16>, vector<128x256xbf16>, vector<8x256xf32> -> vector<8x256xf32>
    %c0_3 = arith.constant 0 : index
    %c0_4 = arith.constant 0 : index
    %4 = vector.load %arg3[%c0_3, %c0_4] : memref<1x256xf32, #tpu.memory_space<vmem>>, vector<1x256xf32>
    %5 = vector.broadcast %4 : vector<1x256xf32> to vector<8x256xf32>
    %6 = arith.addf %3, %5 : vector<8x256xf32>
    %cst_5 = arith.constant 0.000000e+00 : f32
    %7 = vector.broadcast %cst_5 : f32 to vector<8x256xf32>
    %8 = arith.maximumf %6, %7 : vector<8x256xf32>
    %9 = arith.truncf %8 : vector<8x256xf32> to vector<8x256xbf16>
    %c0_6 = arith.constant 0 : index
    %c0_7 = arith.constant 0 : index
    %10 = vector.load %arg4[%c0_6, %c0_7] : memref<256x512xbf16, #tpu.memory_space<vmem>>, vector<256x512xbf16>
    %cst_8 = arith.constant dense<0.000000e+00> : vector<8x512xf32>
    %11 = tpu.matmul %9, %10, %cst_8 {dimension_numbers = #tpu.dot_dimension_numbers<[1], [0], [0], [1], [0, 0, 1, 1], [], []>} : vector<8x256xbf16>, vector<256x512xbf16>, vector<8x512xf32> -> vector<8x512xf32>
    %c0_9 = arith.constant 0 : index
    %c0_10 = arith.constant 0 : index
    %12 = vector.load %arg5[%c0_9, %c0_10] : memref<1x512xf32, #tpu.memory_space<vmem>>, vector<1x512xf32>
    %13 = vector.broadcast %12 : vector<1x512xf32> to vector<8x512xf32>
    %14 = arith.addf %11, %13 : vector<8x512xf32>
    %cst_11 = arith.constant 0.000000e+00 : f32
    %15 = vector.broadcast %cst_11 : f32 to vector<8x512xf32>
    %16 = arith.maximumf %14, %15 : vector<8x512xf32>
    %17 = arith.truncf %16 : vector<8x512xf32> to vector<8x512xbf16>
    %c0_12 = arith.constant 0 : index
    %c0_13 = arith.constant 0 : index
    %18 = vector.load %arg6[%c0_12, %c0_13] : memref<512x1024xbf16, #tpu.memory_space<vmem>>, vector<512x1024xbf16>
    %cst_14 = arith.constant dense<0.000000e+00> : vector<8x1024xf32>
    %19 = tpu.matmul %17, %18, %cst_14 {dimension_numbers = #tpu.dot_dimension_numbers<[1], [0], [0], [1], [0, 0, 1, 1], [], []>} : vector<8x512xbf16>, vector<512x1024xbf16>, vector<8x1024xf32> -> vector<8x1024xf32>
    %c0_15 = arith.constant 0 : index
    %c0_16 = arith.constant 0 : index
    %20 = vector.load %arg7[%c0_15, %c0_16] : memref<1x1024xf32, #tpu.memory_space<vmem>>, vector<1x1024xf32>
    %21 = vector.broadcast %20 : vector<1x1024xf32> to vector<8x1024xf32>
    %22 = arith.addf %19, %21 : vector<8x1024xf32>
    %cst_17 = arith.constant 0.000000e+00 : f32
    %23 = vector.broadcast %cst_17 : f32 to vector<8x1024xf32>
    %24 = arith.maximumf %22, %23 : vector<8x1024xf32>
    %25 = arith.truncf %24 : vector<8x1024xf32> to vector<8x1024xbf16>
    %c0_18 = arith.constant 0 : index
    %c0_19 = arith.constant 0 : index
    %26 = vector.load %arg8[%c0_18, %c0_19] : memref<1024x256xbf16, #tpu.memory_space<vmem>>, vector<1024x256xbf16>
    %cst_20 = arith.constant dense<0.000000e+00> : vector<8x256xf32>
    %27 = tpu.matmul %25, %26, %cst_20 {dimension_numbers = #tpu.dot_dimension_numbers<[1], [0], [0], [1], [0, 0, 1, 1], [], []>} : vector<8x1024xbf16>, vector<1024x256xbf16>, vector<8x256xf32> -> vector<8x256xf32>
    %c0_21 = arith.constant 0 : index
    %c0_22 = arith.constant 0 : index
    %28 = vector.load %arg9[%c0_21, %c0_22] : memref<1x256xf32, #tpu.memory_space<vmem>>, vector<1x256xf32>
    %29 = vector.broadcast %28 : vector<1x256xf32> to vector<8x256xf32>
    %30 = arith.addf %27, %29 : vector<8x256xf32>
    %cst_23 = arith.constant 0.000000e+00 : f32
    %31 = vector.broadcast %cst_23 : f32 to vector<8x256xf32>
    %32 = arith.maximumf %30, %31 : vector<8x256xf32>
    %33 = arith.truncf %32 : vector<8x256xf32> to vector<8x256xbf16>
    %c0_24 = arith.constant 0 : index
    %c0_25 = arith.constant 0 : index
    %34 = vector.load %arg10[%c0_24, %c0_25] : memref<256x784xbf16, #tpu.memory_space<vmem>>, vector<256x784xbf16>
    %cst_26 = arith.constant dense<0.000000e+00> : vector<8x784xf32>
    %35 = tpu.matmul %33, %34, %cst_26 {dimension_numbers = #tpu.dot_dimension_numbers<[1], [0], [0], [1], [0, 0, 1, 1], [], []>} : vector<8x256xbf16>, vector<256x784xbf16>, vector<8x784xf32> -> vector<8x784xf32>
    %c0_27 = arith.constant 0 : index
    %c0_28 = arith.constant 0 : index
    %36 = vector.load %arg11[%c0_27, %c0_28] : memref<1x784xf32, #tpu.memory_space<vmem>>, vector<1x784xf32>
    %37 = vector.broadcast %36 : vector<1x784xf32> to vector<8x784xf32>
    %38 = arith.addf %35, %37 : vector<8x784xf32>
    %39 = math.tanh %38 : vector<8x784xf32>
    %c0_29 = arith.constant 0 : index
    %c0_30 = arith.constant 0 : index
    %40 = vector.load %arg12[%c0_29, %c0_30] : memref<8x784xf32, #tpu.memory_space<vmem>>, vector<8x784xf32>
    tpu.vector_store %arg12[%c0_29, %c0_30], %39 {strides = array<i32>} : memref<8x784xf32, #tpu.memory_space<vmem>>, vector<8x784xf32>,
    return
  }
  func.func @transform_0(%arg0: i32) -> (i32, i32) {
    %c0_i32 = arith.constant 0 : i32
    %c0_i32_0 = arith.constant 0 : i32
    return %arg0, %c0_i32 : i32, i32
  }
  func.func @transform_1(%arg0: i32) -> (i32, i32) {
    %c0_i32 = arith.constant 0 : i32
    %c0_i32_0 = arith.constant 0 : i32
    %c0_i32_1 = arith.constant 0 : i32
    return %c0_i32, %c0_i32_0 : i32, i32
  }
  func.func @transform_2(%arg0: i32) -> (i32, i32) {
    %c0_i32 = arith.constant 0 : i32
    %c0_i32_0 = arith.constant 0 : i32
    %c0_i32_1 = arith.constant 0 : i32
    return %c0_i32, %c0_i32_0 : i32, i32
  }
  func.func @transform_3(%arg0: i32) -> (i32, i32) {
    %c0_i32 = arith.constant 0 : i32
    %c0_i32_0 = arith.constant 0 : i32
    %c0_i32_1 = arith.constant 0 : i32
    return %c0_i32, %c0_i32_0 : i32, i32
  }
  func.func @transform_4(%arg0: i32) -> (i32, i32) {
    %c0_i32 = arith.constant 0 : i32
    %c0_i32_0 = arith.constant 0 : i32
    %c0_i32_1 = arith.constant 0 : i32
    return %c0_i32, %c0_i32_0 : i32, i32
  }
  func.func @transform_5(%arg0: i32) -> (i32, i32) {
    %c0_i32 = arith.constant 0 : i32
    %c0_i32_0 = arith.constant 0 : i32
    %c0_i32_1 = arith.constant 0 : i32
    return %c0_i32, %c0_i32_0 : i32, i32
  }
  func.func @transform_6(%arg0: i32) -> (i32, i32) {
    %c0_i32 = arith.constant 0 : i32
    %c0_i32_0 = arith.constant 0 : i32
    %c0_i32_1 = arith.constant 0 : i32
    return %c0_i32, %c0_i32_0 : i32, i32
  }
  func.func @transform_7(%arg0: i32) -> (i32, i32) {
    %c0_i32 = arith.constant 0 : i32
    %c0_i32_0 = arith.constant 0 : i32
    %c0_i32_1 = arith.constant 0 : i32
    return %c0_i32, %c0_i32_0 : i32, i32
  }
  func.func @transform_8(%arg0: i32) -> (i32, i32) {
    %c0_i32 = arith.constant 0 : i32
    %c0_i32_0 = arith.constant 0 : i32
    %c0_i32_1 = arith.constant 0 : i32
    return %c0_i32, %c0_i32_0 : i32, i32
  }
  func.func @transform_9(%arg0: i32) -> (i32, i32) {
    %c0_i32 = arith.constant 0 : i32
    %c0_i32_0 = arith.constant 0 : i32
    %c0_i32_1 = arith.constant 0 : i32
    return %c0_i32, %c0_i32_0 : i32, i32
  }
  func.func @transform_10(%arg0: i32) -> (i32, i32) {
    %c0_i32 = arith.constant 0 : i32
    %c0_i32_0 = arith.constant 0 : i32
    %c0_i32_1 = arith.constant 0 : i32
    return %c0_i32, %c0_i32_0 : i32, i32
  }
  func.func @transform_11(%arg0: i32) -> (i32, i32) {
    %c0_i32 = arith.constant 0 : i32
    %c0_i32_0 = arith.constant 0 : i32
    return %arg0, %c0_i32 : i32, i32
  }
}

</mosaic_0001>

<bundles_post_ra>
// kernel: tpu_custom_call.1
= control target key start
LH: loop header
LB: loop body
LE: loop exit
PB: predicated region body
PF: predicated region fallthrough
CT: control target
= control target key end

     0   :  { %16 = vsyncpa [#allocation3], 0  ;;  %s6858_s0 = inlined_call_operand.vmem [shape: f32[8,128], index: 0, kind: input, shape index: {}]   ;;  %s6859_s1 = inlined_call_operand.vmem [shape: bf16[128,256], index: 1, kind: input, shape index: {}]   ;;  %s6860_s2 = inlined_call_operand.vmem [shape: f32[1,256], index: 2, kind: input, shape index: {}]   ;;  %s6861_s3 = inlined_call_operand.vmem [shape: bf16[256,512], index: 3, kind: input, shape index: {}]   ;;  %s6862_s4 = inlined_call_operand.vmem [shape: f32[1,512], index: 4, kind: input, shape index: {}]   ;;  %s6863_s5 = inlined_call_operand.hbm [shape: bf16[512,1024], index: 5, kind: input, shape index: {}]   ;;  %s6864_s6 = inlined_call_operand.vmem [shape: f32[1,1024], index: 6, kind: input, shape index: {}]   ;;  %s6865_s7 = inlined_call_operand.vmem [shape: bf16[1024,256], index: 7, kind: input, shape index: {}]   ;;  %s6866_s8 = inlined_call_operand.vmem [shape: f32[1,256], index: 8, kind: input, shape index: {}]   ;;  %s6867_s9 = inlined_call_operand.vmem [shape: bf16[256,784], index: 9, kind: input, shape index: {}]   ;;  %s6868_s10 = inlined_call_operand.vmem [shape: f32[1,784], index: 10, kind: input, shape index: {}]   ;;  %s6869_s11 = inlined_call_operand.hbm [shape: f32[8,784], index: 11, kind: output, shape index: {}]  }
   0x1   :  { %17 = vsyncpa [#allocation4], 0  ;;  %s5684_s17 = smov [#allocation2]   ;;  %s5636_s21 = scalar_lea.hbm %s6863_s5, 32768 }
   0x2   :  { %s33_s18 = sshll.u32 %s5684_s17, 4  ;;  %p5637_p0 = scmp.ne.s32.totalorder %s6863_s5, %s5636_s21  ;;  %s34_s18 = int_to_ptr.vmem [resolvable:$true] %s33_s18 }
   0x3   :  { %p5640_p1 = scmp.lt.u32.totalorder %s5636_s21, %s6863_s5 }
   0x5   :  { %p5642_p2 = pnand %p5640_p1, %p5637_p0 }
   0x7   :  { %5645 = shalt.err (!%p5642_p2)
}
   0x8   :  { %s5646_s26 = scalar_lea.vmem %s34_s18, 32768  ;;  %p5651_p4 = scmp.lt.s32.totalorder %s34_s18, %s34_s18 }
   0x9   :  { %p5647_p3 = scmp.ne.s32.totalorder %s34_s18, %s5646_s26  ;;  %p5652_p5 = scmp.lt.s32.totalorder %s5646_s26, %s5646_s26 }
   0xb   :  { %p5653_p6 = por %p5652_p5, %p5651_p4 }
   0xd   :  { %p5654_p7 = pnand %p5653_p6, %p5647_p3 }
   0xf   :  { %5657 = shalt.err (!%p5654_p7)
}
  0x10   :  { %s5685_s27 = smov 512   ;;  %s5686_s28 = smov 32  }
  0x11   :  { %39 = dma.hbm_to_vmem [thread:$0]  %s6863_s5, 32768, %s34_s18, [#allocation3], %s5685_s27, %s5685_s27, %s5686_s28  }
  0x12   :  { %5680 = dma.done.wait [#allocation3], 32768  }
  0x13   :  { %5681 = vsyncadd [#allocation3], 4294934528  ;;  %v5687_v0 = vmov 0   ;;  %v5150_v1 = vld [vmem:[%s6859_s1 + $0x4] ss:$8 sps:$4 sm:$0xff]   ;;  %vm4492_vm0 = vcmask 130048  }
  0x14   :  { %196 = vmatprep.mubr.bf16.mxu0 %v5687_v0  ;;  %v5152_v2 = vld [vmem:[%s6859_s1] ss:$8 sps:$4 sm:$0xff]   ;;  %164 = vmatprep.subr.bf16.mxu0 %v5150_v1  ;;  %v5153_v3 = vld [vmem:[%s6859_s1 + $0x14] ss:$8 sps:$4 sm:$0xff]   ;;  %v5155_v4 = vld [vmem:[%s6859_s1 + $0x10] ss:$8 sps:$4 sm:$0xff]  }
  0x15   :  { %165 = vmatpush1.bf16.msra.mxu0 %v5152_v2  ;;  %v5156_v5 = vld [vmem:[%s6859_s1 + $0x24] ss:$8 sps:$4 sm:$0xff]   ;;  %v5158_v6 = vld [vmem:[%s6859_s1 + $0x20] ss:$8 sps:$4 sm:$0xff]   ;;  %v5159_v7 = vld [vmem:[%s6859_s1 + $0x34] ss:$8 sps:$4 sm:$0xff]  }
  0x16   :  { %166 = vmatprep.subr.bf16.mxu0 %v5153_v3  ;;  %v5161_v8 = vld [vmem:[%s6859_s1 + $0x30] ss:$8 sps:$4 sm:$0xff]   ;;  %v5174_v9 = vld [vmem:[%s6861_s3 + $0x4] ss:$16 sps:$4 sm:$0xff]   ;;  %v5164_v13 = vld [vmem:[%s6859_s1 + $0x40] ss:$8 sps:$4 sm:$0xff]  }
  0x17   :  { %v5162_v10 = vld [vmem:[%s6859_s1 + $0x44] ss:$8 sps:$4 sm:$0xff]   ;;  %615 = vmatprep.subr.bf16.mxu1 %v5174_v9  ;;  %v5179_v11 = vld [vmem:[%s6861_s3] ss:$16 sps:$4 sm:$0xff]   ;;  %v5165_v14 = vld [vmem:[%s6859_s1 + $0x54] ss:$8 sps:$4 sm:$0xff]  }
  0x18   :  { %v5180_v12 = vld [vmem:[%s6861_s3 + $0x24] ss:$16 sps:$4 sm:$0xff]   ;;  %616 = vmatpush1.bf16.msra.mxu1 %v5179_v11  ;;  %v5185_v15 = vld [vmem:[%s6861_s3 + $0x20] ss:$16 sps:$4 sm:$0xff]   ;;  %v5178_v27 = vld [vmem:[%s6861_s3 + $0xc] ss:$16 sps:$4 sm:$0xff]  }
  0x19   :  { %167 = vmatpush1.bf16.msra.mxu0 %v5155_v4  ;;  %617 = vmatprep.subr.bf16.mxu1 %v5180_v12  ;;  %v5186_v16 = vld [vmem:[%s6861_s3 + $0x44] ss:$16 sps:$4 sm:$0xff]   ;;  %v5167_v17 = vld [vmem:[%s6859_s1 + $0x50] ss:$8 sps:$4 sm:$0xff]   ;;  %v5170_v21 = vld [vmem:[%s6859_s1 + $0x60] ss:$8 sps:$4 sm:$0xff]  }
  0x1a   :  { %168 = vmatprep.subr.bf16.mxu0 %v5156_v5  ;;  %v5168_v18 = vld [vmem:[%s6859_s1 + $0x64] ss:$8 sps:$4 sm:$0xff]   ;;  %v5191_v19 = vld [vmem:[%s6861_s3 + $0x40] ss:$16 sps:$4 sm:$0xff]   ;;  %v5171_v22 = vld [vmem:[%s6859_s1 + $0x74] ss:$8 sps:$4 sm:$0xff]  }
  0x1b   :  { %v5192_v20 = vld [vmem:[%s6861_s3 + $0x64] ss:$16 sps:$4 sm:$0xff]   ;;  %v5197_v23 = vld [vmem:[%s6861_s3 + $0x60] ss:$16 sps:$4 sm:$0xff]   ;;  %v5176_v31 = vld [vmem:[%s6861_s3 + $0x8] ss:$16 sps:$4 sm:$0xff]  }
  0x1c   :  { %618 = vmatpush1.bf16.msra.mxu1 %v5185_v15  ;;  %v5198_v24 = vld [vmem:[%s6861_s3 + $0x84] ss:$16 sps:$4 sm:$0xff]   ;;  %v5173_v25 = vld [vmem:[%s6859_s1 + $0x70] ss:$8 sps:$4 sm:$0xff]   ;;  %v5184_v32 = vld [vmem:[%s6861_s3 + $0x2c] ss:$16 sps:$4 sm:$0xff]  }
  0x1d   :  { %169 = vmatpush1.bf16.msra.mxu0 %v5158_v6  ;;  %619 = vmatprep.subr.bf16.mxu1 %v5186_v16  ;;  %v54_v26 = vld [vmem:[%s6858_s0] sm:$0xff]  ;;  %v5182_v35 = vld [vmem:[%s6861_s3 + $0x28] ss:$16 sps:$4 sm:$0xff]   ;;  %v5190_v36 = vld [vmem:[%s6861_s3 + $0x4c] ss:$16 sps:$4 sm:$0xff]  }
  0x1e   :  { %170 = vmatprep.subr.bf16.mxu0 %v5159_v7  ;;  %v5203_v28 = vld [vmem:[%s6861_s3 + $0x80] ss:$16 sps:$4 sm:$0xff]   ;;  %v5204_v29 = vld [vmem:[%s6861_s3 + $0xa4] ss:$16 sps:$4 sm:$0xff]   ;;  %v55_v30 = vpack.c.bf16 %v54_v26, %v54_v26  ;;  %v5188_v39 = vld [vmem:[%s6861_s3 + $0x48] ss:$16 sps:$4 sm:$0xff]  }
  0x1f   :  { %v5209_v33 = vld [vmem:[%s6861_s3 + $0xa0] ss:$16 sps:$4 sm:$0xff]   ;;  %v5210_v34 = vld [vmem:[%s6861_s3 + $0xc4] ss:$16 sps:$4 sm:$0xff]   ;;  %v5196_v40 = vld [vmem:[%s6861_s3 + $0x6c] ss:$16 sps:$4 sm:$0xff]  }
  0x20   :  { %620 = vmatpush1.bf16.msra.mxu1 %v5191_v19  ;;  %v5215_v37 = vld [vmem:[%s6861_s3 + $0xc0] ss:$16 sps:$4 sm:$0xff]   ;;  %v5216_v38 = vld [vmem:[%s6861_s3 + $0xe4] ss:$16 sps:$4 sm:$0xff]   ;;  %v5194_v43 = vld [vmem:[%s6861_s3 + $0x68] ss:$16 sps:$4 sm:$0xff]  }
  0x21   :  { %171 = vmatpush1.bf16.msra.mxu0 %v5161_v8  ;;  %621 = vmatprep.subr.bf16.mxu1 %v5192_v20  ;;  %v5221_v41 = vld [vmem:[%s6861_s3 + $0xe0] ss:$16 sps:$4 sm:$0xff]   ;;  %v5222_v42 = vld [vmem:[%s6861_s3 + $0x104] ss:$16 sps:$4 sm:$0xff]   ;;  %v5202_v44 = vld [vmem:[%s6861_s3 + $0x8c] ss:$16 sps:$4 sm:$0xff]  }
  0x22   :  { %172 = vmatprep.subr.bf16.mxu0 %v5162_v10  ;;  %v5227_v45 = vld [vmem:[%s6861_s3 + $0x100] ss:$16 sps:$4 sm:$0xff]   ;;  %v5228_v46 = vld [vmem:[%s6861_s3 + $0x124] ss:$16 sps:$4 sm:$0xff]   ;;  %v5200_v47 = vld [vmem:[%s6861_s3 + $0x88] ss:$16 sps:$4 sm:$0xff]  }
  0x23   :  { %v5233_v48 = vld [vmem:[%s6861_s3 + $0x120] ss:$16 sps:$4 sm:$0xff]   ;;  %v5208_v49 = vld [vmem:[%s6861_s3 + $0xac] ss:$16 sps:$4 sm:$0xff]   ;;  %v5234_v50 = vld [vmem:[%s6861_s3 + $0x144] ss:$16 sps:$4 sm:$0xff]  }
  0x24   :  { %622 = vmatpush1.bf16.msra.mxu1 %v5197_v23  ;;  %v5206_v51 = vld [vmem:[%s6861_s3 + $0xa8] ss:$16 sps:$4 sm:$0xff]   ;;  %v5239_v52 = vld [vmem:[%s6861_s3 + $0x140] ss:$16 sps:$4 sm:$0xff]   ;;  %v5214_v53 = vld [vmem:[%s6861_s3 + $0xcc] ss:$16 sps:$4 sm:$0xff]  }
  0x25   :  { %173 = vmatpush1.bf16.msra.mxu0 %v5164_v13  ;;  %623 = vmatprep.subr.bf16.mxu1 %v5198_v24  ;;  %v5240_v54 = vld [vmem:[%s6861_s3 + $0x164] ss:$16 sps:$4 sm:$0xff]   ;;  %v5212_v55 = vld [vmem:[%s6861_s3 + $0xc8] ss:$16 sps:$4 sm:$0xff]   ;;  %v5245_v56 = vld [vmem:[%s6861_s3 + $0x160] ss:$16 sps:$4 sm:$0xff]  }
  0x26   :  { %174 = vmatprep.subr.bf16.mxu0 %v5165_v14  ;;  %v5220_v57 = vld [vmem:[%s6861_s3 + $0xec] ss:$16 sps:$4 sm:$0xff]   ;;  %v5246_v58 = vld [vmem:[%s6861_s3 + $0x184] ss:$16 sps:$4 sm:$0xff]   ;;  %v5218_v59 = vld [vmem:[%s6861_s3 + $0xe8] ss:$16 sps:$4 sm:$0xff]  }
  0x27   :  { %v5251_v60 = vld [vmem:[%s6861_s3 + $0x180] ss:$16 sps:$4 sm:$0xff]   ;;  %v5226_v61 = vld [vmem:[%s6861_s3 + $0x10c] ss:$16 sps:$4 sm:$0xff]   ;;  %v5252_v62 = vld [vmem:[%s6861_s3 + $0x1a4] ss:$16 sps:$4 sm:$0xff]  }
  0x28   :  { %624 = vmatpush1.bf16.msra.mxu1 %v5203_v28  ;;  %v5224_v63 = vld [vmem:[%s6861_s3 + $0x108] ss:$16 sps:$4 sm:$0xff]   ;;  %v5257_v0 = vld [vmem:[%s6861_s3 + $0x1a0] ss:$16 sps:$4 sm:$0xff]   ;;  %v5232_v1 = vld [vmem:[%s6861_s3 + $0x12c] ss:$16 sps:$4 sm:$0xff]  }
  0x29   :  { %175 = vmatpush1.bf16.msra.mxu0 %v5167_v17  ;;  %625 = vmatprep.subr.bf16.mxu1 %v5204_v29  ;;  %v5230_v2 = vld [vmem:[%s6861_s3 + $0x128] ss:$16 sps:$4 sm:$0xff]   ;;  %v5238_v3 = vld [vmem:[%s6861_s3 + $0x14c] ss:$16 sps:$4 sm:$0xff]   ;;  %v5258_v11 = vld [vmem:[%s6861_s3 + $0x1c4] ss:$16 sps:$4 sm:$0xff]  }
  0x2a   :  { %176 = vmatprep.subr.bf16.mxu0 %v5168_v18  ;;  %v5236_v4 = vld [vmem:[%s6861_s3 + $0x148] ss:$16 sps:$4 sm:$0xff]   ;;  %v5244_v5 = vld [vmem:[%s6861_s3 + $0x16c] ss:$16 sps:$4 sm:$0xff]   ;;  %v5263_v14 = vld [vmem:[%s6861_s3 + $0x1c0] ss:$16 sps:$4 sm:$0xff]  }
  0x2b   :  { %v5242_v6 = vld [vmem:[%s6861_s3 + $0x168] ss:$16 sps:$4 sm:$0xff]   ;;  %v5250_v7 = vld [vmem:[%s6861_s3 + $0x18c] ss:$16 sps:$4 sm:$0xff]   ;;  %v5264_v15 = vld [vmem:[%s6861_s3 + $0x1e4] ss:$16 sps:$4 sm:$0xff]  }
  0x2c   :  { %626 = vmatpush1.bf16.msra.mxu1 %v5209_v33  ;;  %v5248_v8 = vld [vmem:[%s6861_s3 + $0x188] ss:$16 sps:$4 sm:$0xff]   ;;  %v5256_v9 = vld [vmem:[%s6861_s3 + $0x1ac] ss:$16 sps:$4 sm:$0xff]   ;;  %v5269_v18 = vld [vmem:[%s6861_s3 + $0x1e0] ss:$16 sps:$4 sm:$0xff]  }
  0x2d   :  { %177 = vmatpush1.bf16.msra.mxu0 %v5170_v21  ;;  %627 = vmatprep.subr.bf16.mxu1 %v5210_v34  ;;  %v5254_v10 = vld [vmem:[%s6861_s3 + $0x1a8] ss:$16 sps:$4 sm:$0xff]   ;;  %v5262_v12 = vld [vmem:[%s6861_s3 + $0x1cc] ss:$16 sps:$4 sm:$0xff]   ;;  %v705_v19 = vld [vmem:[#allocation2] sm:$0xff] }
  0x2e   :  { %178 = vmatprep.subr.bf16.mxu0 %v5171_v22  ;;  %v5260_v13 = vld [vmem:[%s6861_s3 + $0x1c8] ss:$16 sps:$4 sm:$0xff]   ;;  %v5268_v16 = vld [vmem:[%s6861_s3 + $0x1ec] ss:$16 sps:$4 sm:$0xff]   ;;  %v709_v20 = vld [vmem:[#allocation2 + $0x20] sm:$0xff] }
  0x2f   :  { %v5266_v17 = vld [vmem:[%s6861_s3 + $0x1e8] ss:$16 sps:$4 sm:$0xff]   ;;  %v4589_v22 = vcombine.low %v705_v19, %v709_v20  ;;  %v4590_v23 = vcombine.high %v705_v19, %v709_v20  ;;  %v757_v19 = vld [vmem:[#allocation2 + $0x1a0] sm:$0xff] }
  0x30   :  { %628 = vmatpush1.bf16.msra.mxu1 %v5215_v37  ;;  %v706_v21 = vld [vmem:[#allocation2 + $0x8] sm:$0xff] }
  0x31   :  { %179 = vmatpush1.bf16.msra.mxu0 %v5173_v25  ;;  %629 = vmatprep.subr.bf16.mxu1 %v5216_v38  ;;  %v710_v24 = vld [vmem:[#allocation2 + $0x28] sm:$0xff] }
  0x32   :  { %656 = vmatprep.subr.bf16.mxu0 %v5178_v27  ;;  %v4591_v25 = vcombine.low %v706_v21, %v710_v24  ;;  %v4592_v26 = vcombine.high %v706_v21, %v710_v24  ;;  %v74_v27 = vlaneseq  ;;  %v754_v20 = vld [vmem:[#allocation2 + $0x188] sm:$0xff] }
  0x33   :  { %v758_v21 = vld [vmem:[#allocation2 + $0x1a8] sm:$0xff] }
  0x34   :  { %197 = vmatmul.mubr.bf16.vlgmr.msra.gmra.mrb[0].mxu0 %v55_v30  ;;  %630 = vmatpush1.bf16.msra.mxu1 %v5221_v41  ;;  %v6004_v28 = vshrl.u32 %v74_v27, 7  ;;  %v72_v30 = vld [vmem:[%s6860_s2] sm:$0x3] }
  0x35   :  { %657 = vmatpush1.bf16.msra.mxu0 %v5176_v31  ;;  %631 = vmatprep.subr.bf16.mxu1 %v5222_v42  ;;  %v713_v41 = vld [vmem:[#allocation2 + $0x40] sm:$0xff] }
  0x36   :  { %658 = vmatprep.subr.bf16.mxu0 %v5184_v32  ;;  %v6007_v29 = vsub.s32 0, %v6004_v28  ;;  %v6013_v31 = vsub.s32 1, %v6004_v28  ;;  %v765_v27 = vld [vmem:[#allocation2 + $0x1e0] sm:$0xff] }
  0x38   :  { %632 = vmatpush1.bf16.msra.mxu1 %v5227_v45  ;;  %v77_v32 = vrot.slane %v72_v30, %v6007_v29  ;;  %v81_v33 = vrot.slane %v72_v30, %v6013_v31  ;;  %v718_v45 = vld [vmem:[#allocation2 + $0x68] sm:$0xff] }
  0x39   :  { %659 = vmatpush1.bf16.msra.mxu0 %v5182_v35  ;;  %633 = vmatprep.subr.bf16.mxu1 %v5228_v46  ;;  %v762_v30 = vld [vmem:[#allocation2 + $0x1c8] sm:$0xff] }
  0x3a   :  { %660 = vmatprep.subr.bf16.mxu0 %v5190_v36 }
  0x3c   :  { %634 = vmatpush1.bf16.msra.mxu1 %v5233_v48 }
  0x3d   :  { %661 = vmatpush1.bf16.msra.mxu0 %v5188_v39  ;;  %635 = vmatprep.subr.bf16.mxu1 %v5234_v50  ;;  %v721_v50 = vld [vmem:[#allocation2 + $0x80] sm:$0xff] }
  0x3e   :  { %662 = vmatprep.subr.bf16.mxu0 %v5196_v40 }
  0x40   :  { %636 = vmatpush1.bf16.msra.mxu1 %v5239_v52  ;;  %v722_v52 = vld [vmem:[#allocation2 + $0x88] sm:$0xff] }
  0x41   :  { %663 = vmatpush1.bf16.msra.mxu0 %v5194_v43  ;;  %637 = vmatprep.subr.bf16.mxu1 %v5240_v54  ;;  %v717_v43 = vld [vmem:[#allocation2 + $0x60] sm:$0xff] }
  0x42   :  { %664 = vmatprep.subr.bf16.mxu0 %v5202_v44  ;;  %v714_v44 = vld [vmem:[#allocation2 + $0x48] sm:$0xff]  ;;  %v4598_v48 = vcombine.high %v713_v41, %v717_v43  ;;  %v4597_v54 = vcombine.low %v713_v41, %v717_v43 }
  0x44   :  { %638 = vmatpush1.bf16.msra.mxu1 %v5245_v56 }
  0x45   :  { %665 = vmatpush1.bf16.msra.mxu0 %v5200_v47  ;;  %639 = vmatprep.subr.bf16.mxu1 %v5246_v58  ;;  %v729_v58 = vld [vmem:[#allocation2 + $0xc0] sm:$0xff] }
  0x46   :  { %666 = vmatprep.subr.bf16.mxu0 %v5208_v49  ;;  %v4600_v49 = vcombine.high %v714_v44, %v718_v45 }
  0x48   :  { %640 = vmatpush1.bf16.msra.mxu1 %v5251_v60  ;;  %v730_v60 = vld [vmem:[#allocation2 + $0xc8] sm:$0xff] }
  0x49   :  { %667 = vmatpush1.bf16.msra.mxu0 %v5206_v51  ;;  %641 = vmatprep.subr.bf16.mxu1 %v5252_v62  ;;  %v725_v51 = vld [vmem:[#allocation2 + $0xa0] sm:$0xff] }
  0x4a   :  { %668 = vmatprep.subr.bf16.mxu0 %v5214_v53  ;;  %v726_v53 = vld [vmem:[#allocation2 + $0xa8] sm:$0xff]  ;;  %v4606_v56 = vcombine.high %v721_v50, %v725_v51  ;;  %v4605_v62 = vcombine.low %v721_v50, %v725_v51 }
  0x4c   :  { %642 = vmatpush1.bf16.msra.mxu1 %v5257_v0 }
  0x4d   :  { %669 = vmatpush1.bf16.msra.mxu0 %v5212_v55  ;;  %643 = vmatprep.subr.bf16.mxu1 %v5258_v11  ;;  %v4599_v55 = vcombine.low %v714_v44, %v718_v45  ;;  %v749_v11 = vld [vmem:[#allocation2 + $0x160] sm:$0xff] }
  0x4e   :  { %670 = vmatprep.subr.bf16.mxu0 %v5220_v57  ;;  %v4608_v57 = vcombine.high %v722_v52, %v726_v53  ;;  %v777_v45 = vld [vmem:[#allocation2 + $0x240] sm:$0xff] }
  0x50   :  { %644 = vmatpush1.bf16.msra.mxu1 %v5263_v14 }
  0x51   :  { %671 = vmatpush1.bf16.msra.mxu0 %v5218_v59  ;;  %645 = vmatprep.subr.bf16.mxu1 %v5264_v15  ;;  %v733_v59 = vld [vmem:[#allocation2 + $0xe0] sm:$0xff] }
  0x52   :  { %672 = vmatprep.subr.bf16.mxu0 %v5226_v61  ;;  %v734_v61 = vld [vmem:[#allocation2 + $0xe8] sm:$0xff]  ;;  %v4614_v0 = vcombine.high %v729_v58, %v733_v59 }
  0x54   :  { %646 = vmatpush1.bf16.msra.mxu1 %v5269_v18  ;;  %v753_v18 = vld [vmem:[#allocation2 + $0x180] sm:$0xff] }
  0x55   :  { %673 = vmatpush1.bf16.msra.mxu0 %v5224_v63  ;;  %2283 = vmatprep.subr.bf16.mxu1 %v4590_v23  ;;  %v4607_v63 = vcombine.low %v722_v52, %v726_v53  ;;  %v4638_v24 = vcombine.high %v753_v18, %v757_v19  ;;  %v785_v53 = vld [vmem:[#allocation2 + $0x280] sm:$0xff] }
  0x56   :  { %674 = vmatprep.subr.bf16.mxu0 %v5232_v1  ;;  %v4616_v1 = vcombine.high %v730_v60, %v734_v61 }
  0x59   :  { %675 = vmatpush1.bf16.msra.mxu0 %v5230_v2  ;;  %v737_v2 = vld [vmem:[#allocation2 + $0x100] sm:$0xff] }
  0x5a   :  { %676 = vmatprep.subr.bf16.mxu0 %v5238_v3  ;;  %v741_v3 = vld [vmem:[#allocation2 + $0x120] sm:$0xff] }
  0x5b   :  { %v4621_v14 = vcombine.low %v737_v2, %v741_v3 }
  0x5d   :  { %677 = vmatpush1.bf16.msra.mxu0 %v5236_v4  ;;  %v738_v4 = vld [vmem:[#allocation2 + $0x108] sm:$0xff] }
  0x5e   :  { %678 = vmatprep.subr.bf16.mxu0 %v5244_v5  ;;  %v742_v5 = vld [vmem:[#allocation2 + $0x128] sm:$0xff] }
  0x5f   :  { %v4623_v15 = vcombine.low %v738_v4, %v742_v5 }
  0x61   :  { %679 = vmatpush1.bf16.msra.mxu0 %v5242_v6  ;;  %v4613_v6 = vcombine.low %v729_v58, %v733_v59 }
  0x62   :  { %680 = vmatprep.subr.bf16.mxu0 %v5250_v7  ;;  %v4615_v7 = vcombine.low %v730_v60, %v734_v61  ;;  %v793_v61 = vld [vmem:[#allocation2 + $0x2c0] sm:$0xff] }
  0x65   :  { %681 = vmatpush1.bf16.msra.mxu0 %v5248_v8  ;;  %v4622_v8 = vcombine.high %v737_v2, %v741_v3 }
  0x66   :  { %682 = vmatprep.subr.bf16.mxu0 %v5256_v9  ;;  %v4624_v9 = vcombine.high %v738_v4, %v742_v5  ;;  %v801_v5 = vld [vmem:[#allocation2 + $0x300] sm:$0xff] }
  0x69   :  { %683 = vmatpush1.bf16.msra.mxu0 %v5254_v10  ;;  %v745_v10 = vld [vmem:[#allocation2 + $0x140] sm:$0xff] }
  0x6a   :  { %684 = vmatprep.subr.bf16.mxu0 %v5262_v12  ;;  %v746_v12 = vld [vmem:[#allocation2 + $0x148] sm:$0xff] }
  0x6d   :  { %685 = vmatpush1.bf16.msra.mxu0 %v5260_v13  ;;  %v750_v13 = vld [vmem:[#allocation2 + $0x168] sm:$0xff] }
  0x6e   :  { %686 = vmatprep.subr.bf16.mxu0 %v5268_v16  ;;  %v4630_v16 = vcombine.high %v745_v10, %v749_v11  ;;  %v4631_v23 = vcombine.low %v746_v12, %v750_v13 }
  0x71   :  { %687 = vmatpush1.bf16.msra.mxu0 %v5266_v17  ;;  %v4632_v17 = vcombine.high %v746_v12, %v750_v13  ;;  %v809_v13 = vld [vmem:[#allocation2 + $0x340] sm:$0xff] }
  0x72   :  { %2365 = vmatprep.subr.bf16.mxu0 %v4592_v26  ;;  %v761_v26 = vld [vmem:[#allocation2 + $0x1c0] sm:$0xff] }
  0x73   :  { %v4645_v41 = vcombine.low %v761_v26, %v765_v27 }
 0x107   :  { %v198_v34 = vpop.f32.mrb[0].mxu0 }
 0x108   :  { %v199_v35 = vadd.f32 %v198_v34, %v77_v32  ;;  %v200_v36 = vpop.f32.mrb[1].mxu0  ;;  %v766_v32 = vld [vmem:[#allocation2 + $0x1e8] sm:$0xff]  ;;  %v4639_v34 = vcombine.low %v754_v20, %v758_v21 }
 0x109   :  { %v201_v37 = vadd.f32 %v200_v36, %v81_v33  ;;  %v202_v38 = vpop.f32.mrb[2].mxu0  ;;  %v4637_v33 = vcombine.low %v753_v18, %v757_v19  ;;  %v4648_v36 = vcombine.high %v762_v30, %v766_v32 }
 0x10a   :  { %v205_v39 = vmax.f32 %v199_v35, 0.0  ;;  %v203_v40 = vpop.f32.mrb[3].mxu0  ;;  %v4646_v35 = vcombine.high %v761_v26, %v765_v27  ;;  %v773_v38 = vld [vmem:[#allocation2 + $0x220] sm:$0xff]  ;;  %v822_v27 = vld [vmem:[#allocation2 + $0x3a8] sm:$0xff] }
 0x10b   :  { %v206_v42 = vmax.f32 %v201_v37, 0.0  ;;  %v769_v37 = vld [vmem:[#allocation2 + $0x200] sm:$0xff]  ;;  %v774_v40 = vld [vmem:[#allocation2 + $0x228] sm:$0xff] }
 0x10c   :  { %v207_v47 = vpack.c.bf16 %v205_v39, %v205_v39  ;;  %v770_v39 = vld [vmem:[#allocation2 + $0x208] sm:$0xff]  ;;  %v4654_v43 = vcombine.high %v769_v37, %v773_v38 }
 0x10d   :  { %v208_v46 = vpack.c.bf16 %v206_v42, %v206_v42  ;;  %v4647_v42 = vcombine.low %v762_v30, %v766_v32  ;;  %v4656_v44 = vcombine.high %v770_v39, %v774_v40  ;;  %v4655_v50 = vcombine.low %v770_v39, %v774_v40 }
 0x10f   :  { %647 = vmatprep.mubr.bf16.mxu1 %v208_v46  ;;  %688 = vmatprep.mubr.bf16.mxu0 %v208_v46  ;;  %v781_v46 = vld [vmem:[#allocation2 + $0x260] sm:$0xff] }
 0x110   :  { %648 = vmatmul.mubr.bf16.vlgmr.msra.gmra.mrb[0].mxu1 %v207_v47  ;;  %689 = vmatmul.mubr.bf16.vlgmr.msra.gmra.mrb[4].mxu0 %v207_v47  ;;  %v778_v47 = vld [vmem:[#allocation2 + $0x248] sm:$0xff]  ;;  %v4662_v51 = vcombine.high %v777_v45, %v781_v46 }
 0x111   :  { %2284 = vmatpush1.bf16.msra.mxu1 %v4589_v22  ;;  %2366 = vmatpush1.bf16.msra.mxu0 %v4591_v25  ;;  %v4629_v22 = vcombine.low %v745_v10, %v749_v11  ;;  %v4640_v25 = vcombine.high %v754_v20, %v758_v21 }
 0x112   :  { %2285 = vmatprep.subr.bf16.mxu1 %v4598_v48  ;;  %2367 = vmatprep.subr.bf16.mxu0 %v4600_v49  ;;  %v782_v48 = vld [vmem:[#allocation2 + $0x268] sm:$0xff]  ;;  %v4653_v49 = vcombine.low %v769_v37, %v773_v38 }
 0x113   :  { %v4664_v52 = vcombine.high %v778_v47, %v782_v48  ;;  %v4663_v58 = vcombine.low %v778_v47, %v782_v48  ;;  %v830_v38 = vld [vmem:[#allocation2 + $0x3e8] sm:$0xff] }
 0x115   :  { %2286 = vmatpush1.bf16.msra.mxu1 %v4597_v54  ;;  %2368 = vmatpush1.bf16.msra.mxu0 %v4599_v55  ;;  %v789_v54 = vld [vmem:[#allocation2 + $0x2a0] sm:$0xff]  ;;  %v786_v55 = vld [vmem:[#allocation2 + $0x288] sm:$0xff] }
 0x116   :  { %2287 = vmatprep.subr.bf16.mxu1 %v4606_v56  ;;  %2369 = vmatprep.subr.bf16.mxu0 %v4608_v57  ;;  %v790_v56 = vld [vmem:[#allocation2 + $0x2a8] sm:$0xff]  ;;  %v4661_v57 = vcombine.low %v777_v45, %v781_v46  ;;  %v4670_v59 = vcombine.high %v785_v53, %v789_v54 }
 0x117   :  { %v4672_v60 = vcombine.high %v786_v55, %v790_v56  ;;  %v4671_v2 = vcombine.low %v786_v55, %v790_v56  ;;  %v838_v46 = vld [vmem:[#allocation2 + $0x428] sm:$0xff] }
 0x119   :  { %2288 = vmatpush1.bf16.msra.mxu1 %v4605_v62  ;;  %2370 = vmatpush1.bf16.msra.mxu0 %v4607_v63  ;;  %v797_v62 = vld [vmem:[#allocation2 + $0x2e0] sm:$0xff]  ;;  %v794_v63 = vld [vmem:[#allocation2 + $0x2c8] sm:$0xff] }
 0x11a   :  { %2289 = vmatprep.subr.bf16.mxu1 %v4614_v0  ;;  %2371 = vmatprep.subr.bf16.mxu0 %v4616_v1  ;;  %v798_v0 = vld [vmem:[#allocation2 + $0x2e8] sm:$0xff]  ;;  %v4669_v1 = vcombine.low %v785_v53, %v789_v54  ;;  %v4678_v3 = vcombine.high %v793_v61, %v797_v62 }
 0x11b   :  { %v4680_v4 = vcombine.high %v794_v63, %v798_v0  ;;  %v4679_v10 = vcombine.low %v794_v63, %v798_v0 }
 0x11d   :  { %2290 = vmatpush1.bf16.msra.mxu1 %v4613_v6  ;;  %2372 = vmatpush1.bf16.msra.mxu0 %v4615_v7  ;;  %v805_v6 = vld [vmem:[#allocation2 + $0x320] sm:$0xff]  ;;  %v802_v7 = vld [vmem:[#allocation2 + $0x308] sm:$0xff] }
 0x11e   :  { %2291 = vmatprep.subr.bf16.mxu1 %v4622_v8  ;;  %2373 = vmatprep.subr.bf16.mxu0 %v4624_v9  ;;  %v806_v8 = vld [vmem:[#allocation2 + $0x328] sm:$0xff]  ;;  %v4677_v9 = vcombine.low %v793_v61, %v797_v62  ;;  %v4686_v11 = vcombine.high %v801_v5, %v805_v6 }
 0x11f   :  { %v4688_v12 = vcombine.high %v802_v7, %v806_v8  ;;  %v4687_v18 = vcombine.low %v802_v7, %v806_v8  ;;  %v842_v7 = vld [vmem:[#allocation2 + $0x448] sm:$0xff] }
 0x120   :  { %v846_v8 = vld [vmem:[#allocation2 + $0x468] sm:$0xff] }
 0x121   :  { %2292 = vmatpush1.bf16.msra.mxu1 %v4621_v14  ;;  %2374 = vmatpush1.bf16.msra.mxu0 %v4623_v15  ;;  %v813_v14 = vld [vmem:[#allocation2 + $0x360] sm:$0xff]  ;;  %v810_v15 = vld [vmem:[#allocation2 + $0x348] sm:$0xff] }
 0x122   :  { %2293 = vmatprep.subr.bf16.mxu1 %v4630_v16  ;;  %2375 = vmatprep.subr.bf16.mxu0 %v4632_v17  ;;  %v814_v16 = vld [vmem:[#allocation2 + $0x368] sm:$0xff]  ;;  %v4685_v17 = vcombine.low %v801_v5, %v805_v6  ;;  %v4694_v19 = vcombine.high %v809_v13, %v813_v14  ;;  %v4693_v21 = vcombine.low %v809_v13, %v813_v14  ;;  %v845_v6 = vld [vmem:[#allocation2 + $0x460] sm:$0xff] }
 0x123   :  { %v4696_v20 = vcombine.high %v810_v15, %v814_v16  ;;  %v4728_v13 = vcombine.high %v842_v7, %v846_v8  ;;  %v853_v14 = vld [vmem:[#allocation2 + $0x4a0] sm:$0xff] }
 0x125   :  { %2294 = vmatpush1.bf16.msra.mxu1 %v4629_v22  ;;  %2376 = vmatpush1.bf16.msra.mxu0 %v4631_v23  ;;  %v4695_v22 = vcombine.low %v810_v15, %v814_v16  ;;  %v817_v23 = vld [vmem:[#allocation2 + $0x380] sm:$0xff]  ;;  %v850_v15 = vld [vmem:[#allocation2 + $0x488] sm:$0xff] }
 0x126   :  { %2295 = vmatprep.subr.bf16.mxu1 %v4638_v24  ;;  %2377 = vmatprep.subr.bf16.mxu0 %v4640_v25  ;;  %v821_v24 = vld [vmem:[#allocation2 + $0x3a0] sm:$0xff]  ;;  %v818_v25 = vld [vmem:[#allocation2 + $0x388] sm:$0xff] }
 0x127   :  { %v4702_v26 = vcombine.high %v817_v23, %v821_v24  ;;  %v4701_v30 = vcombine.low %v817_v23, %v821_v24  ;;  %v4703_v32 = vcombine.low %v818_v25, %v822_v27  ;;  %v854_v16 = vld [vmem:[#allocation2 + $0x4a8] sm:$0xff]  ;;  %v861_v23 = vld [vmem:[#allocation2 + $0x4e0] sm:$0xff] }
 0x128   :  { %v858_v24 = vld [vmem:[#allocation2 + $0x4c8] sm:$0xff] }
 0x129   :  { %2296 = vmatpush1.bf16.msra.mxu1 %v4637_v33  ;;  %2378 = vmatpush1.bf16.msra.mxu0 %v4639_v34  ;;  %v4704_v33 = vcombine.high %v818_v25, %v822_v27  ;;  %v825_v34 = vld [vmem:[#allocation2 + $0x3c0] sm:$0xff]  ;;  %v862_v25 = vld [vmem:[#allocation2 + $0x4e8] sm:$0xff]  ;;  %v4735_v27 = vcombine.low %v850_v15, %v854_v16 }
 0x12a   :  { %2297 = vmatprep.subr.bf16.mxu1 %v4646_v35  ;;  %2379 = vmatprep.subr.bf16.mxu0 %v4648_v36  ;;  %v829_v35 = vld [vmem:[#allocation2 + $0x3e0] sm:$0xff]  ;;  %v826_v36 = vld [vmem:[#allocation2 + $0x3c8] sm:$0xff] }
 0x12b   :  { %v4710_v37 = vcombine.high %v825_v34, %v829_v35  ;;  %v4709_v39 = vcombine.low %v825_v34, %v829_v35  ;;  %v4711_v40 = vcombine.low %v826_v36, %v830_v38  ;;  %v869_v34 = vld [vmem:[#allocation2 + $0x520] sm:$0xff]  ;;  %v866_v35 = vld [vmem:[#allocation2 + $0x508] sm:$0xff] }
 0x12d   :  { %2298 = vmatpush1.bf16.msra.mxu1 %v4645_v41  ;;  %2380 = vmatpush1.bf16.msra.mxu0 %v4647_v42  ;;  %v4712_v41 = vcombine.high %v826_v36, %v830_v38  ;;  %v833_v42 = vld [vmem:[#allocation2 + $0x400] sm:$0xff]  ;;  %v870_v36 = vld [vmem:[#allocation2 + $0x528] sm:$0xff]  ;;  %v4743_v38 = vcombine.low %v858_v24, %v862_v25 }
 0x12e   :  { %2299 = vmatprep.subr.bf16.mxu1 %v4654_v43  ;;  %2381 = vmatprep.subr.bf16.mxu0 %v4656_v44  ;;  %v837_v43 = vld [vmem:[#allocation2 + $0x420] sm:$0xff]  ;;  %v834_v44 = vld [vmem:[#allocation2 + $0x408] sm:$0xff] }
 0x12f   :  { %v4718_v45 = vcombine.high %v833_v42, %v837_v43  ;;  %v4717_v47 = vcombine.low %v833_v42, %v837_v43  ;;  %v4719_v48 = vcombine.low %v834_v44, %v838_v46  ;;  %v877_v42 = vld [vmem:[#allocation2 + $0x560] sm:$0xff]  ;;  %v874_v43 = vld [vmem:[#allocation2 + $0x548] sm:$0xff] }
 0x131   :  { %2300 = vmatpush1.bf16.msra.mxu1 %v4653_v49  ;;  %2382 = vmatpush1.bf16.msra.mxu0 %v4655_v50  ;;  %v4720_v49 = vcombine.high %v834_v44, %v838_v46  ;;  %v6020_v50 = vld [vmem:[%s6862_s4] sm:$0xf]  ;;  %v878_v44 = vld [vmem:[#allocation2 + $0x568] sm:$0xff]  ;;  %v4751_v46 = vcombine.low %v866_v35, %v870_v36 }
 0x132   :  { %2301 = vmatprep.subr.bf16.mxu1 %v4662_v51  ;;  %2383 = vmatprep.subr.bf16.mxu0 %v4664_v52  ;;  %v6023_v51 = vsub.s32 3, %v6004_v28  ;;  %v278_v52 = vrot.slane %v6020_v50, %v6007_v29  ;;  %v282_v53 = vrot.slane %v6020_v50, %v6013_v31 }
 0x134   :  { %v290_v54 = vrot.slane %v6020_v50, %v6023_v51 }
 0x135   :  { %2302 = vmatpush1.bf16.msra.mxu1 %v4661_v57  ;;  %2384 = vmatpush1.bf16.msra.mxu0 %v4663_v58 }
 0x136   :  { %2303 = vmatprep.subr.bf16.mxu1 %v4670_v59  ;;  %2385 = vmatprep.subr.bf16.mxu0 %v4672_v60 }
 0x139   :  { %2304 = vmatpush1.bf16.msra.mxu1 %v4669_v1  ;;  %2386 = vmatpush1.bf16.msra.mxu0 %v4671_v2 }
 0x13a   :  { %2305 = vmatprep.subr.bf16.mxu1 %v4678_v3  ;;  %2387 = vmatprep.subr.bf16.mxu0 %v4680_v4  ;;  %v841_v4 = vld [vmem:[#allocation2 + $0x440] sm:$0xff] }
 0x13d   :  { %2306 = vmatpush1.bf16.msra.mxu1 %v4677_v9  ;;  %2388 = vmatpush1.bf16.msra.mxu0 %v4679_v10 }
 0x13e   :  { %2307 = vmatprep.subr.bf16.mxu1 %v4686_v11  ;;  %2389 = vmatprep.subr.bf16.mxu0 %v4688_v12  ;;  %v849_v11 = vld [vmem:[#allocation2 + $0x480] sm:$0xff]  ;;  %v4726_v12 = vcombine.high %v841_v4, %v845_v6 }
 0x141   :  { %2308 = vmatpush1.bf16.msra.mxu1 %v4685_v17  ;;  %2390 = vmatpush1.bf16.msra.mxu0 %v4687_v18  ;;  %v4725_v18 = vcombine.low %v841_v4, %v845_v6  ;;  %v897_v4 = vld [vmem:[#allocation2 + $0x600] sm:$0xff]  ;;  %v898_v6 = vld [vmem:[#allocation2 + $0x608] sm:$0xff] }
 0x142   :  { %2309 = vmatprep.subr.bf16.mxu1 %v4694_v19  ;;  %2391 = vmatprep.subr.bf16.mxu0 %v4696_v20  ;;  %v4727_v19 = vcombine.low %v842_v7, %v846_v8  ;;  %v4734_v20 = vcombine.high %v849_v11, %v853_v14  ;;  %v902_v7 = vld [vmem:[#allocation2 + $0x628] sm:$0xff] }
 0x145   :  { %2310 = vmatpush1.bf16.msra.mxu1 %v4693_v21  ;;  %2392 = vmatpush1.bf16.msra.mxu0 %v4695_v22  ;;  %v4736_v21 = vcombine.high %v850_v15, %v854_v16  ;;  %v857_v22 = vld [vmem:[#allocation2 + $0x4c0] sm:$0xff]  ;;  %v906_v16 = vld [vmem:[#allocation2 + $0x648] sm:$0xff] }
 0x146   :  { %2311 = vmatprep.subr.bf16.mxu1 %v4702_v26  ;;  %2393 = vmatprep.subr.bf16.mxu0 %v4704_v33  ;;  %v4733_v26 = vcombine.low %v849_v11, %v853_v14  ;;  %v865_v33 = vld [vmem:[#allocation2 + $0x500] sm:$0xff] }
 0x147   :  { %v905_v14 = vld [vmem:[#allocation2 + $0x640] sm:$0xff] }
 0x148   :  { %v909_v15 = vld [vmem:[#allocation2 + $0x660] sm:$0xff] }
 0x149   :  { %2312 = vmatpush1.bf16.msra.mxu1 %v4701_v30  ;;  %2394 = vmatpush1.bf16.msra.mxu0 %v4703_v32  ;;  %v4742_v30 = vcombine.high %v857_v22, %v861_v23  ;;  %v4744_v32 = vcombine.high %v858_v24, %v862_v25  ;;  %v917_v24 = vld [vmem:[#allocation2 + $0x6a0] sm:$0xff]  ;;  %v914_v25 = vld [vmem:[#allocation2 + $0x688] sm:$0xff] }
 0x14a   :  { %2313 = vmatprep.subr.bf16.mxu1 %v4710_v37  ;;  %2395 = vmatprep.subr.bf16.mxu0 %v4712_v41  ;;  %v4741_v37 = vcombine.low %v857_v22, %v861_v23  ;;  %v873_v41 = vld [vmem:[#allocation2 + $0x540] sm:$0xff] }
 0x14b   :  { %v913_v23 = vld [vmem:[#allocation2 + $0x680] sm:$0xff] }
 0x14d   :  { %2314 = vmatpush1.bf16.msra.mxu1 %v4709_v39  ;;  %2396 = vmatpush1.bf16.msra.mxu0 %v4711_v40  ;;  %v4750_v39 = vcombine.high %v865_v33, %v869_v34  ;;  %v4752_v40 = vcombine.high %v866_v35, %v870_v36  ;;  %v925_v35 = vld [vmem:[#allocation2 + $0x6e0] sm:$0xff]  ;;  %v922_v36 = vld [vmem:[#allocation2 + $0x6c8] sm:$0xff] }
 0x14e   :  { %2324 = vmatprep.subr.bf16.mxu1 %v4718_v45  ;;  %2406 = vmatprep.subr.bf16.mxu0 %v4720_v49  ;;  %v4749_v45 = vcombine.low %v865_v33, %v869_v34  ;;  %v881_v49 = vld [vmem:[#allocation2 + $0x580] sm:$0xff] }
 0x14f   :  { %v921_v34 = vld [vmem:[#allocation2 + $0x6c0] sm:$0xff] }
 0x1e3   :  { %v649_v55 = vpop.f32.mrb[0].mxu1  ;;  %v6031_v56 = vpop.f32.mrb[4].mxu0 }
 0x1e4   :  { %v650_v57 = vadd.f32 %v649_v55, %v278_v52  ;;  %v651_v58 = vpop.f32.mrb[1].mxu1  ;;  %v692_v59 = vpop.f32.mrb[5].mxu0  ;;  %v885_v52 = vld [vmem:[#allocation2 + $0x5a0] sm:$0xff]  ;;  %v4757_v55 = vcombine.low %v873_v41, %v877_v42 }
 0x1e5   :  { %v652_v60 = vadd.f32 %v651_v58, %v282_v53  ;;  %v693_v61 = vadd.f32 %v692_v59, %v290_v54  ;;  %v653_v62 = vpop.f32.mrb[2].mxu1  ;;  %v694_v63 = vpop.f32.mrb[6].mxu0  ;;  %v882_v53 = vld [vmem:[#allocation2 + $0x588] sm:$0xff]  ;;  %v4766_v58 = vcombine.high %v881_v49, %v885_v52 }
 0x1e6   :  { %v697_v0 = vmax.f32 %v650_v57, 0.0  ;;  %v654_v1 = vpop.f32.mrb[3].mxu1  ;;  %v695_v2 = vpop.f32.mrb[7].mxu0  ;;  %v886_v54 = vld [vmem:[#allocation2 + $0x5a8] sm:$0xff]  ;;  %v4759_v57 = vcombine.low %v874_v43, %v878_v44 }
 0x1e7   :  { %v698_v3 = vmax.f32 %v652_v60, 0.0  ;;  %v700_v5 = vmax.f32 %v693_v61, 0.0  ;;  %v4768_v59 = vcombine.high %v882_v53, %v886_v54  ;;  %v889_v60 = vld [vmem:[#allocation2 + $0x5c0] sm:$0xff]  ;;  %v890_v62 = vld [vmem:[#allocation2 + $0x5c8] sm:$0xff]  ;;  %v4767_v1 = vcombine.low %v882_v53, %v886_v54 }
 0x1e8   :  { %v6035_v10 = vpack.c.bf16 %v697_v0, %v697_v0  ;;  %v893_v61 = vld [vmem:[#allocation2 + $0x5e0] sm:$0xff]  ;;  %v894_v63 = vld [vmem:[#allocation2 + $0x5e8] sm:$0xff]  ;;  %v4765_v0 = vcombine.low %v881_v49, %v885_v52 }
 0x1e9   :  { %v6033_v9 = vpack.c.bf16 %v698_v3, %v698_v3  ;;  %v6039_v17 = vpack.c.bf16 %v700_v5, %v700_v5  ;;  %v4774_v2 = vcombine.high %v889_v60, %v893_v61  ;;  %v4776_v3 = vcombine.high %v890_v62, %v894_v63  ;;  %v901_v5 = vld [vmem:[#allocation2 + $0x620] sm:$0xff]  ;;  %v938_v54 = vld [vmem:[#allocation2 + $0x748] sm:$0xff] }
 0x1ea   :  { %v4773_v8 = vcombine.low %v889_v60, %v893_v61  ;;  %v4775_v11 = vcombine.low %v890_v62, %v894_v63  ;;  %v937_v52 = vld [vmem:[#allocation2 + $0x740] sm:$0xff] }
 0x1eb   :  { %2315 = vmatprep.mubr.bf16.mxu1 %v6033_v9  ;;  %2397 = vmatprep.mubr.bf16.mxu0 %v6033_v9  ;;  %v941_v53 = vld [vmem:[#allocation2 + $0x760] sm:$0xff] }
 0x1ec   :  { %2316 = vmatmul.mubr.bf16.vlgmr.msra.gmra.mrb[4].mxu1 %v6035_v10  ;;  %2398 = vmatmul.mubr.bf16.vlgmr.msra.gmra.mrb[8].mxu0 %v6035_v10  ;;  %v4822_v60 = vcombine.high %v937_v52, %v941_v53  ;;  %v945_v62 = vld [vmem:[#allocation2 + $0x780] sm:$0xff] }
 0x1ed   :  { %2325 = vmatpush1.bf16.msra.mxu1 %v4717_v47  ;;  %2407 = vmatpush1.bf16.msra.mxu0 %v4719_v48  ;;  %v4758_v47 = vcombine.high %v873_v41, %v877_v42  ;;  %v4760_v48 = vcombine.high %v874_v43, %v878_v44  ;;  %v929_v42 = vld [vmem:[#allocation2 + $0x700] sm:$0xff]  ;;  %v930_v44 = vld [vmem:[#allocation2 + $0x708] sm:$0xff] }
 0x1ee   :  { %2356 = vmatprep.mubr.bf16.mxu1 %v6039_v17  ;;  %2438 = vmatprep.mubr.bf16.mxu0 %v6039_v17  ;;  %v933_v43 = vld [vmem:[#allocation2 + $0x720] sm:$0xff] }
 0x1ef   :  { %2326 = vmatprep.subr.bf16.mxu1 %v4726_v12  ;;  %2408 = vmatprep.subr.bf16.mxu0 %v4728_v13  ;;  %v4782_v12 = vcombine.high %v897_v4, %v901_v5  ;;  %v4784_v13 = vcombine.high %v898_v6, %v902_v7  ;;  %v949_v63 = vld [vmem:[#allocation2 + $0x7a0] sm:$0xff] }
 0x1f1   :  { %2327 = vmatpush1.bf16.msra.mxu1 %v4725_v18  ;;  %2409 = vmatpush1.bf16.msra.mxu0 %v4727_v19  ;;  %v910_v18 = vld [vmem:[#allocation2 + $0x668] sm:$0xff]  ;;  %v4781_v19 = vcombine.low %v897_v4, %v901_v5  ;;  %v4830_v5 = vcombine.high %v945_v62, %v949_v63 }
 0x1f2   :  { %2328 = vmatprep.subr.bf16.mxu1 %v4734_v20  ;;  %2410 = vmatprep.subr.bf16.mxu0 %v4736_v21  ;;  %v4783_v20 = vcombine.low %v898_v6, %v902_v7  ;;  %v4790_v21 = vcombine.high %v905_v14, %v909_v15  ;;  %v4792_v22 = vcombine.high %v906_v16, %v910_v18  ;;  %v953_v7 = vld [vmem:[#allocation2 + $0x7c0] sm:$0xff] }
 0x1f5   :  { %2329 = vmatpush1.bf16.msra.mxu1 %v4733_v26  ;;  %2411 = vmatpush1.bf16.msra.mxu0 %v4735_v27  ;;  %v918_v26 = vld [vmem:[#allocation2 + $0x6a8] sm:$0xff]  ;;  %v4789_v27 = vcombine.low %v905_v14, %v909_v15 }
 0x1f6   :  { %2330 = vmatprep.subr.bf16.mxu1 %v4742_v30  ;;  %2412 = vmatprep.subr.bf16.mxu0 %v4744_v32  ;;  %v4791_v30 = vcombine.low %v906_v16, %v910_v18  ;;  %v4798_v32 = vcombine.high %v913_v23, %v917_v24  ;;  %v4800_v33 = vcombine.high %v914_v25, %v918_v26 }
 0x1f9   :  { %2331 = vmatpush1.bf16.msra.mxu1 %v4741_v37  ;;  %2413 = vmatpush1.bf16.msra.mxu0 %v4743_v38  ;;  %v926_v37 = vld [vmem:[#allocation2 + $0x6e8] sm:$0xff]  ;;  %v4797_v38 = vcombine.low %v913_v23, %v917_v24 }
 0x1fa   :  { %2332 = vmatprep.subr.bf16.mxu1 %v4750_v39  ;;  %2414 = vmatprep.subr.bf16.mxu0 %v4752_v40  ;;  %v4799_v39 = vcombine.low %v914_v25, %v918_v26  ;;  %v4806_v40 = vcombine.high %v921_v34, %v925_v35  ;;  %v4808_v41 = vcombine.high %v922_v36, %v926_v37 }
 0x1fd   :  { %2333 = vmatpush1.bf16.msra.mxu1 %v4749_v45  ;;  %2415 = vmatpush1.bf16.msra.mxu0 %v4751_v46  ;;  %v934_v45 = vld [vmem:[#allocation2 + $0x728] sm:$0xff]  ;;  %v4805_v46 = vcombine.low %v921_v34, %v925_v35 }
 0x1fe   :  { %2334 = vmatprep.subr.bf16.mxu1 %v4758_v47  ;;  %2416 = vmatprep.subr.bf16.mxu0 %v4760_v48  ;;  %v4807_v47 = vcombine.low %v922_v36, %v926_v37  ;;  %v4814_v48 = vcombine.high %v929_v42, %v933_v43  ;;  %v4816_v49 = vcombine.high %v930_v44, %v934_v45 }
 0x201   :  { %2335 = vmatpush1.bf16.msra.mxu1 %v4757_v55  ;;  %2417 = vmatpush1.bf16.msra.mxu0 %v4759_v57  ;;  %v942_v55 = vld [vmem:[#allocation2 + $0x768] sm:$0xff]  ;;  %v4813_v57 = vcombine.low %v929_v42, %v933_v43 }
 0x202   :  { %2336 = vmatprep.subr.bf16.mxu1 %v4766_v58  ;;  %2418 = vmatprep.subr.bf16.mxu0 %v4768_v59  ;;  %v4815_v58 = vcombine.low %v930_v44, %v934_v45  ;;  %v6046_v59 = vsub.s32 2, %v6004_v28  ;;  %v4824_v61 = vcombine.high %v938_v54, %v942_v55 }
 0x204   :  { %v286_v4 = vrot.slane %v6020_v50, %v6046_v59  ;;  %v711_v50 = vld [vmem:[#allocation2 + $0x30] sm:$0xff] }
 0x205   :  { %2337 = vmatpush1.bf16.msra.mxu1 %v4765_v0  ;;  %2419 = vmatpush1.bf16.msra.mxu0 %v4767_v1  ;;  %v946_v0 = vld [vmem:[#allocation2 + $0x788] sm:$0xff] }
 0x206   :  { %2338 = vmatprep.subr.bf16.mxu1 %v4774_v2  ;;  %2420 = vmatprep.subr.bf16.mxu0 %v4776_v3  ;;  %v950_v1 = vld [vmem:[#allocation2 + $0x7a8] sm:$0xff]  ;;  %v4821_v2 = vcombine.low %v937_v52, %v941_v53  ;;  %v4823_v3 = vcombine.low %v938_v54, %v942_v55  ;;  %v691_v15 = vadd.f32 %v6031_v56, %v286_v4  ;;  %v716_v56 = vld [vmem:[#allocation2 + $0x58] sm:$0xff] }
 0x207   :  { %v4832_v6 = vcombine.high %v946_v0, %v950_v1  ;;  %v4831_v14 = vcombine.low %v946_v0, %v950_v1  ;;  %v747_v1 = vld [vmem:[#allocation2 + $0x150] sm:$0xff]  ;;  %v752_v4 = vld [vmem:[#allocation2 + $0x178] sm:$0xff] }
 0x208   :  { %v699_v24 = vmax.f32 %v691_v15, 0.0 }
 0x209   :  { %2339 = vmatpush1.bf16.msra.mxu1 %v4773_v8  ;;  %2421 = vmatpush1.bf16.msra.mxu0 %v4775_v11  ;;  %v957_v8 = vld [vmem:[#allocation2 + $0x7e0] sm:$0xff]  ;;  %v954_v11 = vld [vmem:[#allocation2 + $0x7c8] sm:$0xff] }
 0x20a   :  { %2340 = vmatprep.subr.bf16.mxu1 %v4782_v12  ;;  %2422 = vmatprep.subr.bf16.mxu0 %v4784_v13  ;;  %v958_v12 = vld [vmem:[#allocation2 + $0x7e8] sm:$0xff]  ;;  %v4829_v13 = vcombine.low %v945_v62, %v949_v63  ;;  %v4838_v16 = vcombine.high %v953_v7, %v957_v8  ;;  %v6051_v34 = vpack.c.bf16 %v699_v24, %v699_v24 }
 0x20b   :  { %v4840_v18 = vcombine.high %v954_v11, %v958_v12  ;;  %v4839_v23 = vcombine.low %v954_v11, %v958_v12  ;;  %v755_v11 = vld [vmem:[#allocation2 + $0x190] sm:$0xff] }
 0x20c   :  { %v759_v12 = vld [vmem:[#allocation2 + $0x1b0] sm:$0xff] }
 0x20d   :  { %2341 = vmatpush1.bf16.msra.mxu1 %v4781_v19  ;;  %2423 = vmatpush1.bf16.msra.mxu0 %v4783_v20  ;;  %v707_v19 = vld [vmem:[#allocation2 + $0x10] sm:$0xff]  ;;  %v708_v20 = vld [vmem:[#allocation2 + $0x18] sm:$0xff] }
 0x20e   :  { %2342 = vmatprep.subr.bf16.mxu1 %v4790_v21  ;;  %2424 = vmatprep.subr.bf16.mxu0 %v4792_v22  ;;  %v712_v21 = vld [vmem:[#allocation2 + $0x38] sm:$0xff]  ;;  %v4837_v22 = vcombine.low %v953_v7, %v957_v8  ;;  %v4594_v25 = vcombine.high %v707_v19, %v711_v50 }
 0x20f   :  { %v4596_v26 = vcombine.high %v708_v20, %v712_v21  ;;  %v4595_v35 = vcombine.low %v708_v20, %v712_v21  ;;  %v767_v20 = vld [vmem:[#allocation2 + $0x1f0] sm:$0xff]  ;;  %v764_v21 = vld [vmem:[#allocation2 + $0x1d8] sm:$0xff] }
 0x211   :  { %2343 = vmatpush1.bf16.msra.mxu1 %v4789_v27  ;;  %2425 = vmatpush1.bf16.msra.mxu0 %v4791_v30  ;;  %v715_v27 = vld [vmem:[#allocation2 + $0x50] sm:$0xff] }
 0x212   :  { %2344 = vmatprep.subr.bf16.mxu1 %v4798_v32  ;;  %2426 = vmatprep.subr.bf16.mxu0 %v4800_v33  ;;  %v719_v30 = vld [vmem:[#allocation2 + $0x70] sm:$0xff]  ;;  %v720_v32 = vld [vmem:[#allocation2 + $0x78] sm:$0xff]  ;;  %v4593_v33 = vcombine.low %v707_v19, %v711_v50 }
 0x213   :  { %v4602_v36 = vcombine.high %v715_v27, %v719_v30  ;;  %v4604_v37 = vcombine.high %v716_v56, %v720_v32  ;;  %v4601_v42 = vcombine.low %v715_v27, %v719_v30  ;;  %v4603_v43 = vcombine.low %v716_v56, %v720_v32  ;;  %v763_v50 = vld [vmem:[#allocation2 + $0x1d0] sm:$0xff]  ;;  %v772_v56 = vld [vmem:[#allocation2 + $0x218] sm:$0xff] }
 0x214   :  { %v771_v27 = vld [vmem:[#allocation2 + $0x210] sm:$0xff]  ;;  %v776_v32 = vld [vmem:[#allocation2 + $0x238] sm:$0xff] }
 0x215   :  { %2345 = vmatpush1.bf16.msra.mxu1 %v4797_v38  ;;  %2427 = vmatpush1.bf16.msra.mxu0 %v4799_v39  ;;  %v723_v38 = vld [vmem:[#allocation2 + $0x90] sm:$0xff] }
 0x216   :  { %2346 = vmatprep.subr.bf16.mxu1 %v4806_v40  ;;  %2428 = vmatprep.subr.bf16.mxu0 %v4808_v41  ;;  %v727_v39 = vld [vmem:[#allocation2 + $0xb0] sm:$0xff]  ;;  %v724_v40 = vld [vmem:[#allocation2 + $0x98] sm:$0xff] }
 0x217   :  { %v728_v41 = vld [vmem:[#allocation2 + $0xb8] sm:$0xff]  ;;  %v4610_v44 = vcombine.high %v723_v38, %v727_v39  ;;  %v4609_v52 = vcombine.low %v723_v38, %v727_v39  ;;  %v775_v30 = vld [vmem:[#allocation2 + $0x230] sm:$0xff] }
 0x218   :  { %v4612_v45 = vcombine.high %v724_v40, %v728_v41  ;;  %v4611_v53 = vcombine.low %v724_v40, %v728_v41  ;;  %v779_v38 = vld [vmem:[#allocation2 + $0x250] sm:$0xff]  ;;  %v780_v40 = vld [vmem:[#allocation2 + $0x258] sm:$0xff] }
 0x219   :  { %2347 = vmatpush1.bf16.msra.mxu1 %v4805_v46  ;;  %2429 = vmatpush1.bf16.msra.mxu0 %v4807_v47  ;;  %v731_v46 = vld [vmem:[#allocation2 + $0xd0] sm:$0xff]  ;;  %v784_v41 = vld [vmem:[#allocation2 + $0x278] sm:$0xff] }
 0x21a   :  { %2348 = vmatprep.subr.bf16.mxu1 %v4814_v48  ;;  %2430 = vmatprep.subr.bf16.mxu0 %v4816_v49  ;;  %v735_v47 = vld [vmem:[#allocation2 + $0xf0] sm:$0xff]  ;;  %v732_v48 = vld [vmem:[#allocation2 + $0xd8] sm:$0xff] }
 0x21b   :  { %v736_v49 = vld [vmem:[#allocation2 + $0xf8] sm:$0xff]  ;;  %v4618_v54 = vcombine.high %v731_v46, %v735_v47  ;;  %v783_v39 = vld [vmem:[#allocation2 + $0x270] sm:$0xff] }
 0x21c   :  { %v4620_v55 = vcombine.high %v732_v48, %v736_v49  ;;  %v4619_v62 = vcombine.low %v732_v48, %v736_v49  ;;  %v788_v48 = vld [vmem:[#allocation2 + $0x298] sm:$0xff] }
 0x21d   :  { %2349 = vmatpush1.bf16.msra.mxu1 %v4813_v57  ;;  %2431 = vmatpush1.bf16.msra.mxu0 %v4815_v58  ;;  %v739_v57 = vld [vmem:[#allocation2 + $0x110] sm:$0xff]  ;;  %v792_v49 = vld [vmem:[#allocation2 + $0x2b8] sm:$0xff] }
 0x21e   :  { %2350 = vmatprep.subr.bf16.mxu1 %v4822_v60  ;;  %2432 = vmatprep.subr.bf16.mxu0 %v4824_v61  ;;  %v743_v58 = vld [vmem:[#allocation2 + $0x130] sm:$0xff]  ;;  %v744_v60 = vld [vmem:[#allocation2 + $0x138] sm:$0xff]  ;;  %v4617_v61 = vcombine.low %v731_v46, %v735_v47 }
 0x21f   :  { %v4626_v63 = vcombine.high %v739_v57, %v743_v58  ;;  %v787_v46 = vld [vmem:[#allocation2 + $0x290] sm:$0xff] }
 0x220   :  { %v791_v47 = vld [vmem:[#allocation2 + $0x2b0] sm:$0xff] }
 0x221   :  { %2351 = vmatpush1.bf16.msra.mxu1 %v4821_v2  ;;  %2433 = vmatpush1.bf16.msra.mxu0 %v4823_v3  ;;  %v751_v2 = vld [vmem:[#allocation2 + $0x170] sm:$0xff]  ;;  %v748_v3 = vld [vmem:[#allocation2 + $0x158] sm:$0xff] }
 0x222   :  { %2352 = vmatprep.subr.bf16.mxu1 %v4830_v5  ;;  %2434 = vmatprep.subr.bf16.mxu0 %v4832_v6  ;;  %v4625_v5 = vcombine.low %v739_v57, %v743_v58  ;;  %v4634_v7 = vcombine.high %v747_v1, %v751_v2  ;;  %v4636_v8 = vcombine.high %v748_v3, %v752_v4  ;;  %v795_v57 = vld [vmem:[#allocation2 + $0x2d0] sm:$0xff] }
 0x223   :  { %v4633_v15 = vcombine.low %v747_v1, %v751_v2  ;;  %v799_v58 = vld [vmem:[#allocation2 + $0x2f0] sm:$0xff] }
 0x224   :  { %v803_v1 = vld [vmem:[#allocation2 + $0x310] sm:$0xff] }
 0x225   :  { %2353 = vmatpush1.bf16.msra.mxu1 %v4829_v13  ;;  %2435 = vmatpush1.bf16.msra.mxu0 %v4831_v14  ;;  %v756_v13 = vld [vmem:[#allocation2 + $0x198] sm:$0xff]  ;;  %v807_v2 = vld [vmem:[#allocation2 + $0x330] sm:$0xff] }
 0x226   :  { %2354 = vmatprep.subr.bf16.mxu1 %v4838_v16  ;;  %2436 = vmatprep.subr.bf16.mxu0 %v4840_v18  ;;  %v760_v14 = vld [vmem:[#allocation2 + $0x1b8] sm:$0xff]  ;;  %v4635_v16 = vcombine.low %v748_v3, %v752_v4  ;;  %v4642_v18 = vcombine.high %v755_v11, %v759_v12 }
 0x227   :  { %v4644_v19 = vcombine.high %v756_v13, %v760_v14  ;;  %v4643_v24 = vcombine.low %v756_v13, %v760_v14  ;;  %v804_v3 = vld [vmem:[#allocation2 + $0x318] sm:$0xff] }
 0x228   :  { %v808_v4 = vld [vmem:[#allocation2 + $0x338] sm:$0xff] }
 0x229   :  { %2355 = vmatpush1.bf16.msra.mxu1 %v4837_v22  ;;  %2437 = vmatpush1.bf16.msra.mxu0 %v4839_v23  ;;  %v768_v22 = vld [vmem:[#allocation2 + $0x1f8] sm:$0xff]  ;;  %v4641_v23 = vcombine.low %v755_v11, %v759_v12  ;;  %v811_v11 = vld [vmem:[#allocation2 + $0x350] sm:$0xff] }
 0x22a   :  { %2447 = vmatprep.subr.bf16.mxu1 %v4594_v25  ;;  %2529 = vmatprep.subr.bf16.mxu0 %v4596_v26  ;;  %v4650_v25 = vcombine.high %v763_v50, %v767_v20  ;;  %v4652_v26 = vcombine.high %v764_v21, %v768_v22  ;;  %v815_v12 = vld [vmem:[#allocation2 + $0x370] sm:$0xff]  ;;  %v812_v13 = vld [vmem:[#allocation2 + $0x358] sm:$0xff] }
 0x22b   :  { %v816_v14 = vld [vmem:[#allocation2 + $0x378] sm:$0xff] }
 0x22c   :  { %2357 = vmatmul.mubr.bf16.vlgmr.msra.gmra.mrb[4].mxu1 %v6051_v34  ;;  %2439 = vmatmul.mubr.bf16.vlgmr.msra.gmra.mrb[8].mxu0 %v6051_v34 }
 0x22d   :  { %2448 = vmatpush1.bf16.msra.mxu1 %v4593_v33  ;;  %2479 = vmatprep.mubr.bf16.mxu1 %v6033_v9  ;;  %v4649_v33 = vcombine.low %v763_v50, %v767_v20  ;;  %v819_v50 = vld [vmem:[#allocation2 + $0x390] sm:$0xff] }
 0x22e   :  { %2530 = vmatpush1.bf16.msra.mxu0 %v4595_v35  ;;  %2561 = vmatprep.mubr.bf16.mxu0 %v6033_v9  ;;  %v740_v9 = vld [vmem:[#allocation2 + $0x118] sm:$0xff]  ;;  %v4651_v35 = vcombine.low %v764_v21, %v768_v22  ;;  %v823_v20 = vld [vmem:[#allocation2 + $0x3b0] sm:$0xff] }
 0x22f   :  { %2449 = vmatprep.subr.bf16.mxu1 %v4602_v36  ;;  %2531 = vmatprep.subr.bf16.mxu0 %v4604_v37  ;;  %v4628_v0 = vcombine.high %v740_v9, %v744_v60  ;;  %v4627_v6 = vcombine.low %v740_v9, %v744_v60  ;;  %v4658_v36 = vcombine.high %v771_v27, %v775_v30  ;;  %v796_v9 = vld [vmem:[#allocation2 + $0x2d8] sm:$0xff] }
 0x230   :  { %v4660_v37 = vcombine.high %v772_v56, %v776_v32  ;;  %v800_v60 = vld [vmem:[#allocation2 + $0x2f8] sm:$0xff] }
 0x231   :  { %2450 = vmatpush1.bf16.msra.mxu1 %v4601_v42  ;;  %v4657_v42 = vcombine.low %v771_v27, %v775_v30  ;;  %v820_v21 = vld [vmem:[#allocation2 + $0x398] sm:$0xff]  ;;  %v827_v27 = vld [vmem:[#allocation2 + $0x3d0] sm:$0xff] }
 0x232   :  { %2532 = vmatpush1.bf16.msra.mxu0 %v4603_v43  ;;  %2451 = vmatprep.subr.bf16.mxu1 %v4610_v44  ;;  %v4659_v43 = vcombine.low %v772_v56, %v776_v32  ;;  %v4666_v44 = vcombine.high %v779_v38, %v783_v39  ;;  %v824_v22 = vld [vmem:[#allocation2 + $0x3b8] sm:$0xff]  ;;  %v831_v30 = vld [vmem:[#allocation2 + $0x3f0] sm:$0xff] }
 0x233   :  { %2533 = vmatprep.subr.bf16.mxu0 %v4612_v45  ;;  %v4668_v45 = vcombine.high %v780_v40, %v784_v41  ;;  %v828_v56 = vld [vmem:[#allocation2 + $0x3d8] sm:$0xff] }
 0x234   :  { %v832_v32 = vld [vmem:[#allocation2 + $0x3f8] sm:$0xff] }
 0x235   :  { %2452 = vmatpush1.bf16.msra.mxu1 %v4609_v52  ;;  %v4665_v52 = vcombine.low %v779_v38, %v783_v39  ;;  %v835_v38 = vld [vmem:[#allocation2 + $0x410] sm:$0xff] }
 0x236   :  { %2534 = vmatpush1.bf16.msra.mxu0 %v4611_v53  ;;  %2453 = vmatprep.subr.bf16.mxu1 %v4618_v54  ;;  %v4667_v53 = vcombine.low %v780_v40, %v784_v41  ;;  %v4674_v54 = vcombine.high %v787_v46, %v791_v47  ;;  %v839_v39 = vld [vmem:[#allocation2 + $0x430] sm:$0xff]  ;;  %v836_v40 = vld [vmem:[#allocation2 + $0x418] sm:$0xff] }
 0x237   :  { %2535 = vmatprep.subr.bf16.mxu0 %v4620_v55  ;;  %v4676_v55 = vcombine.high %v788_v48, %v792_v49  ;;  %v840_v41 = vld [vmem:[#allocation2 + $0x438] sm:$0xff] }
 0x239   :  { %2454 = vmatpush1.bf16.msra.mxu1 %v4617_v61  ;;  %v4673_v61 = vcombine.low %v787_v46, %v791_v47  ;;  %v843_v46 = vld [vmem:[#allocation2 + $0x450] sm:$0xff] }
 0x23a   :  { %2536 = vmatpush1.bf16.msra.mxu0 %v4619_v62  ;;  %2455 = vmatprep.subr.bf16.mxu1 %v4626_v63  ;;  %v4675_v62 = vcombine.low %v788_v48, %v792_v49  ;;  %v4682_v63 = vcombine.high %v795_v57, %v799_v58  ;;  %v847_v47 = vld [vmem:[#allocation2 + $0x470] sm:$0xff]  ;;  %v4721_v48 = vcombine.low %v835_v38, %v839_v39  ;;  %v844_v49 = vld [vmem:[#allocation2 + $0x458] sm:$0xff] }
 0x23b   :  { %2537 = vmatprep.subr.bf16.mxu0 %v4628_v0  ;;  %v4684_v0 = vcombine.high %v796_v9, %v800_v60 }
 0x23d   :  { %2456 = vmatpush1.bf16.msra.mxu1 %v4625_v5  ;;  %v4681_v5 = vcombine.low %v795_v57, %v799_v58  ;;  %v855_v57 = vld [vmem:[#allocation2 + $0x4b0] sm:$0xff] }
 0x23e   :  { %2538 = vmatpush1.bf16.msra.mxu0 %v4627_v6  ;;  %2457 = vmatprep.subr.bf16.mxu1 %v4634_v7  ;;  %v4683_v6 = vcombine.low %v796_v9, %v800_v60  ;;  %v4690_v7 = vcombine.high %v803_v1, %v807_v2  ;;  %v852_v9 = vld [vmem:[#allocation2 + $0x498] sm:$0xff] }
 0x23f   :  { %2539 = vmatprep.subr.bf16.mxu0 %v4636_v8  ;;  %v4692_v8 = vcombine.high %v804_v3, %v808_v4  ;;  %v856_v60 = vld [vmem:[#allocation2 + $0x4b8] sm:$0xff] }
 0x241   :  { %2458 = vmatpush1.bf16.msra.mxu1 %v4633_v15  ;;  %v4689_v15 = vcombine.low %v803_v1, %v807_v2  ;;  %v859_v1 = vld [vmem:[#allocation2 + $0x4d0] sm:$0xff] }
 0x242   :  { %2540 = vmatpush1.bf16.msra.mxu0 %v4635_v16  ;;  %2459 = vmatprep.subr.bf16.mxu1 %v4642_v18  ;;  %v4691_v16 = vcombine.low %v804_v3, %v808_v4  ;;  %v4698_v18 = vcombine.high %v811_v11, %v815_v12  ;;  %v863_v2 = vld [vmem:[#allocation2 + $0x4f0] sm:$0xff]  ;;  %v860_v3 = vld [vmem:[#allocation2 + $0x4d8] sm:$0xff] }
 0x243   :  { %2541 = vmatprep.subr.bf16.mxu0 %v4644_v19  ;;  %v4700_v19 = vcombine.high %v812_v13, %v816_v14  ;;  %v864_v4 = vld [vmem:[#allocation2 + $0x4f8] sm:$0xff] }
 0x245   :  { %2460 = vmatpush1.bf16.msra.mxu1 %v4641_v23  ;;  %v4697_v23 = vcombine.low %v811_v11, %v815_v12  ;;  %v871_v11 = vld [vmem:[#allocation2 + $0x530] sm:$0xff]  ;;  %v868_v12 = vld [vmem:[#allocation2 + $0x518] sm:$0xff] }
 0x246   :  { %2542 = vmatpush1.bf16.msra.mxu0 %v4643_v24  ;;  %2461 = vmatprep.subr.bf16.mxu1 %v4650_v25  ;;  %v4699_v24 = vcombine.low %v812_v13, %v816_v14  ;;  %v4706_v25 = vcombine.high %v819_v50, %v823_v20  ;;  %v872_v13 = vld [vmem:[#allocation2 + $0x538] sm:$0xff]  ;;  %v4747_v14 = vcombine.low %v860_v3, %v864_v4 }
 0x247   :  { %2543 = vmatprep.subr.bf16.mxu0 %v4652_v26  ;;  %v4708_v26 = vcombine.high %v820_v21, %v824_v22 }
 0x249   :  { %2462 = vmatpush1.bf16.msra.mxu1 %v4649_v33  ;;  %v4705_v33 = vcombine.low %v819_v50, %v823_v20  ;;  %v876_v50 = vld [vmem:[#allocation2 + $0x558] sm:$0xff] }
 0x24a   :  { %2544 = vmatpush1.bf16.msra.mxu0 %v4651_v35  ;;  %2463 = vmatprep.subr.bf16.mxu1 %v4658_v36  ;;  %v4707_v35 = vcombine.low %v820_v21, %v824_v22  ;;  %v4714_v36 = vcombine.high %v827_v27, %v831_v30  ;;  %v880_v20 = vld [vmem:[#allocation2 + $0x578] sm:$0xff]  ;;  %v4755_v22 = vcombine.low %v868_v12, %v872_v13 }
 0x24b   :  { %2545 = vmatprep.subr.bf16.mxu0 %v4660_v37  ;;  %v4716_v37 = vcombine.high %v828_v56, %v832_v32 }
 0x24d   :  { %2464 = vmatpush1.bf16.msra.mxu1 %v4657_v42  ;;  %v4713_v42 = vcombine.low %v827_v27, %v831_v30  ;;  %v884_v27 = vld [vmem:[#allocation2 + $0x598] sm:$0xff] }
 0x24e   :  { %2546 = vmatpush1.bf16.msra.mxu0 %v4659_v43  ;;  %2465 = vmatprep.subr.bf16.mxu1 %v4666_v44  ;;  %v4715_v43 = vcombine.low %v828_v56, %v832_v32  ;;  %v4722_v44 = vcombine.high %v835_v38, %v839_v39  ;;  %v888_v30 = vld [vmem:[#allocation2 + $0x5b8] sm:$0xff]  ;;  %v4763_v32 = vcombine.low %v876_v50, %v880_v20 }
 0x24f   :  { %2547 = vmatprep.subr.bf16.mxu0 %v4668_v45  ;;  %v4724_v45 = vcombine.high %v836_v40, %v840_v41  ;;  %v892_v38 = vld [vmem:[#allocation2 + $0x5d8] sm:$0xff] }
 0x250   :  { %v896_v39 = vld [vmem:[#allocation2 + $0x5f8] sm:$0xff] }
 0x251   :  { %2466 = vmatpush1.bf16.msra.mxu1 %v4665_v52  ;;  %v848_v52 = vld [vmem:[#allocation2 + $0x478] sm:$0xff] }
 0x252   :  { %2548 = vmatpush1.bf16.msra.mxu0 %v4667_v53  ;;  %2467 = vmatprep.subr.bf16.mxu1 %v4674_v54  ;;  %v4723_v53 = vcombine.low %v836_v40, %v840_v41  ;;  %v4730_v54 = vcombine.high %v843_v46, %v847_v47  ;;  %v4732_v58 = vcombine.high %v844_v49, %v848_v52 }
 0x253   :  { %2549 = vmatprep.subr.bf16.mxu0 %v4676_v55  ;;  %v851_v55 = vld [vmem:[#allocation2 + $0x490] sm:$0xff]  ;;  %v4771_v41 = vcombine.low %v884_v27, %v888_v30 }
 0x255   :  { %2468 = vmatpush1.bf16.msra.mxu1 %v4673_v61  ;;  %v4729_v61 = vcombine.low %v843_v46, %v847_v47  ;;  %v900_v46 = vld [vmem:[#allocation2 + $0x618] sm:$0xff] }
 0x256   :  { %2550 = vmatpush1.bf16.msra.mxu0 %v4675_v62  ;;  %2469 = vmatprep.subr.bf16.mxu1 %v4682_v63  ;;  %v4731_v62 = vcombine.low %v844_v49, %v848_v52  ;;  %v4738_v63 = vcombine.high %v851_v55, %v855_v57  ;;  %v904_v47 = vld [vmem:[#allocation2 + $0x638] sm:$0xff]  ;;  %v4779_v49 = vcombine.low %v892_v38, %v896_v39 }
 0x257   :  { %2551 = vmatprep.subr.bf16.mxu0 %v4684_v0  ;;  %v4740_v0 = vcombine.high %v852_v9, %v856_v60 }
 0x259   :  { %2470 = vmatpush1.bf16.msra.mxu1 %v4681_v5  ;;  %v4737_v5 = vcombine.low %v851_v55, %v855_v57  ;;  %v911_v55 = vld [vmem:[#allocation2 + $0x670] sm:$0xff]  ;;  %v908_v57 = vld [vmem:[#allocation2 + $0x658] sm:$0xff] }
 0x25a   :  { %2552 = vmatpush1.bf16.msra.mxu0 %v4683_v6  ;;  %2471 = vmatprep.subr.bf16.mxu1 %v4690_v7  ;;  %v4746_v6 = vcombine.high %v859_v1, %v863_v2  ;;  %v4748_v7 = vcombine.high %v860_v3, %v864_v4 }
 0x25b   :  { %2553 = vmatprep.subr.bf16.mxu0 %v4692_v8  ;;  %v867_v8 = vld [vmem:[#allocation2 + $0x510] sm:$0xff] }
 0x25c   :  { %v4753_v21 = vcombine.low %v867_v8, %v871_v11 }
 0x25d   :  { %2472 = vmatpush1.bf16.msra.mxu1 %v4689_v15  ;;  %v4754_v15 = vcombine.high %v867_v8, %v871_v11  ;;  %v924_v8 = vld [vmem:[#allocation2 + $0x6d8] sm:$0xff] }
 0x25e   :  { %2554 = vmatpush1.bf16.msra.mxu0 %v4691_v16  ;;  %2473 = vmatprep.subr.bf16.mxu1 %v4698_v18  ;;  %v4756_v16 = vcombine.high %v868_v12, %v872_v13  ;;  %v875_v18 = vld [vmem:[#allocation2 + $0x550] sm:$0xff]  ;;  %v928_v11 = vld [vmem:[#allocation2 + $0x6f8] sm:$0xff] }
 0x25f   :  { %2555 = vmatprep.subr.bf16.mxu0 %v4700_v19  ;;  %v879_v19 = vld [vmem:[#allocation2 + $0x570] sm:$0xff] }
 0x260   :  { %v4761_v56 = vcombine.low %v875_v18, %v879_v19 }
 0x261   :  { %2474 = vmatpush1.bf16.msra.mxu1 %v4697_v23  ;;  %v4762_v23 = vcombine.high %v875_v18, %v879_v19  ;;  %v932_v18 = vld [vmem:[#allocation2 + $0x718] sm:$0xff] }
 0x262   :  { %2556 = vmatpush1.bf16.msra.mxu0 %v4699_v24  ;;  %2475 = vmatprep.subr.bf16.mxu1 %v4706_v25  ;;  %v4764_v24 = vcombine.high %v876_v50, %v880_v20  ;;  %v883_v25 = vld [vmem:[#allocation2 + $0x590] sm:$0xff]  ;;  %v936_v19 = vld [vmem:[#allocation2 + $0x738] sm:$0xff]  ;;  %v4811_v20 = vcombine.low %v924_v8, %v928_v11 }
 0x263   :  { %2557 = vmatprep.subr.bf16.mxu0 %v4708_v26  ;;  %v887_v26 = vld [vmem:[#allocation2 + $0x5b0] sm:$0xff] }
 0x264   :  { %v4769_v40 = vcombine.low %v883_v25, %v887_v26 }
 0x265   :  { %2476 = vmatpush1.bf16.msra.mxu1 %v4705_v33  ;;  %v4770_v33 = vcombine.high %v883_v25, %v887_v26  ;;  %v940_v25 = vld [vmem:[#allocation2 + $0x758] sm:$0xff] }
 0x266   :  { %2558 = vmatpush1.bf16.msra.mxu0 %v4707_v35  ;;  %2477 = vmatprep.subr.bf16.mxu1 %v4714_v36  ;;  %v4772_v35 = vcombine.high %v884_v27, %v888_v30  ;;  %v891_v36 = vld [vmem:[#allocation2 + $0x5d0] sm:$0xff]  ;;  %v944_v26 = vld [vmem:[#allocation2 + $0x778] sm:$0xff]  ;;  %v4819_v30 = vcombine.low %v932_v18, %v936_v19 }
 0x267   :  { %2559 = vmatprep.subr.bf16.mxu0 %v4716_v37  ;;  %v895_v37 = vld [vmem:[#allocation2 + $0x5f0] sm:$0xff] }
 0x269   :  { %2478 = vmatpush1.bf16.msra.mxu1 %v4713_v42  ;;  %v4778_v42 = vcombine.high %v891_v36, %v895_v37 }
 0x26a   :  { %2560 = vmatpush1.bf16.msra.mxu0 %v4715_v43  ;;  %2488 = vmatprep.subr.bf16.mxu1 %v4722_v44  ;;  %v4780_v43 = vcombine.high %v892_v38, %v896_v39  ;;  %v899_v44 = vld [vmem:[#allocation2 + $0x610] sm:$0xff]  ;;  %v4827_v39 = vcombine.low %v940_v25, %v944_v26 }
 0x26b   :  { %2570 = vmatprep.subr.bf16.mxu0 %v4724_v45  ;;  %v903_v45 = vld [vmem:[#allocation2 + $0x630] sm:$0xff] }
 0x26c   :  { %2480 = vmatmul.mubr.bf16.vlgmr.msra.gmra.mrb[8].mxu1 %v6035_v10  ;;  %v4786_v52 = vcombine.high %v899_v44, %v903_v45 }
 0x26d   :  { %2562 = vmatmul.mubr.bf16.vlgmr.msra.gmra.mrb[12].mxu0 %v6035_v10  ;;  %2489 = vmatpush1.bf16.msra.mxu1 %v4721_v48  ;;  %v4739_v10 = vcombine.low %v852_v9, %v856_v60  ;;  %v4777_v48 = vcombine.low %v891_v36, %v895_v37  ;;  %v4785_v9 = vcombine.low %v899_v44, %v903_v45  ;;  %v948_v36 = vld [vmem:[#allocation2 + $0x798] sm:$0xff] }
 0x26e   :  { %2520 = vmatprep.mubr.bf16.mxu1 %v6039_v17  ;;  %2571 = vmatpush1.bf16.msra.mxu0 %v4723_v53  ;;  %v4788_v53 = vcombine.high %v900_v46, %v904_v47  ;;  %v4787_v60 = vcombine.low %v900_v46, %v904_v47  ;;  %v952_v37 = vld [vmem:[#allocation2 + $0x7b8] sm:$0xff] }
 0x26f   :  { %2602 = vmatprep.mubr.bf16.mxu0 %v6039_v17  ;;  %2490 = vmatprep.subr.bf16.mxu1 %v4730_v54  ;;  %v4745_v17 = vcombine.low %v859_v1, %v863_v2  ;;  %v907_v54 = vld [vmem:[#allocation2 + $0x650] sm:$0xff]  ;;  %v916_v1 = vld [vmem:[#allocation2 + $0x698] sm:$0xff]  ;;  %v4835_v47 = vcombine.low %v948_v36, %v952_v37 }
 0x270   :  { %2572 = vmatprep.subr.bf16.mxu0 %v4732_v58  ;;  %v912_v58 = vld [vmem:[#allocation2 + $0x678] sm:$0xff]  ;;  %v4793_v3 = vcombine.low %v907_v54, %v911_v55 }
 0x271   :  { %2491 = vmatpush1.bf16.msra.mxu1 %v4729_v61  ;;  %v4794_v61 = vcombine.high %v907_v54, %v911_v55  ;;  %v920_v2 = vld [vmem:[#allocation2 + $0x6b8] sm:$0xff]  ;;  %v4795_v4 = vcombine.low %v908_v57, %v912_v58  ;;  %v5272_v54 = vld [vmem:[%s6865_s7 + $0x4] ss:$8 sps:$4 sm:$0xff]   ;;  %v5270_v55 = vld [vmem:[%s6865_s7] ss:$8 sps:$4 sm:$0xff]  }
 0x272   :  { %2573 = vmatpush1.bf16.msra.mxu0 %v4731_v62  ;;  %2492 = vmatprep.subr.bf16.mxu1 %v4738_v63  ;;  %v4796_v62 = vcombine.high %v908_v57, %v912_v58  ;;  %v915_v63 = vld [vmem:[#allocation2 + $0x690] sm:$0xff]  ;;  %v4803_v13 = vcombine.low %v916_v1, %v920_v2  ;;  %v956_v44 = vld [vmem:[#allocation2 + $0x7d8] sm:$0xff] }
 0x273   :  { %2574 = vmatprep.subr.bf16.mxu0 %v4740_v0  ;;  %v919_v0 = vld [vmem:[#allocation2 + $0x6b0] sm:$0xff]  ;;  %v960_v45 = vld [vmem:[#allocation2 + $0x7f8] sm:$0xff] }
 0x274   :  { %v4801_v12 = vcombine.low %v915_v63, %v919_v0  ;;  %v5275_v57 = vld [vmem:[%s6865_s7 + $0x14] ss:$8 sps:$4 sm:$0xff]   ;;  %v5273_v58 = vld [vmem:[%s6865_s7 + $0x10] ss:$8 sps:$4 sm:$0xff]  }
 0x275   :  { %2493 = vmatpush1.bf16.msra.mxu1 %v4737_v5  ;;  %v4802_v5 = vcombine.high %v915_v63, %v919_v0  ;;  %v5282_v63 = vld [vmem:[%s6865_s7 + $0x40] ss:$8 sps:$4 sm:$0xff]   ;;  %v5287_v0 = vld [vmem:[%s6865_s7 + $0x54] ss:$8 sps:$4 sm:$0xff]  }
 0x276   :  { %2575 = vmatpush1.bf16.msra.mxu0 %v4739_v10  ;;  %2494 = vmatprep.subr.bf16.mxu1 %v4746_v6  ;;  %v4804_v10 = vcombine.high %v916_v1, %v920_v2  ;;  %v923_v6 = vld [vmem:[#allocation2 + $0x6d0] sm:$0xff]  ;;  %v5290_v2 = vld [vmem:[%s6865_s7 + $0x64] ss:$8 sps:$4 sm:$0xff]  }
 0x277   :  { %2576 = vmatprep.subr.bf16.mxu0 %v4748_v7  ;;  %v927_v7 = vld [vmem:[#allocation2 + $0x6f0] sm:$0xff] }
 0x278   :  { %v4809_v50 = vcombine.low %v923_v6, %v927_v7  ;;  %v5285_v1 = vld [vmem:[%s6865_s7 + $0x50] ss:$8 sps:$4 sm:$0xff]  }
 0x279   :  { %2495 = vmatpush1.bf16.msra.mxu1 %v4745_v17  ;;  %v4810_v17 = vcombine.high %v923_v6, %v927_v7  ;;  %v5294_v6 = vld [vmem:[%s6865_s7 + $0x80] ss:$8 sps:$4 sm:$0xff]   ;;  %v5299_v7 = vld [vmem:[%s6865_s7 + $0x94] ss:$8 sps:$4 sm:$0xff]  }
 0x27a   :  { %2577 = vmatpush1.bf16.msra.mxu0 %v4747_v14  ;;  %2496 = vmatprep.subr.bf16.mxu1 %v4754_v15  ;;  %v4812_v14 = vcombine.high %v924_v8, %v928_v11  ;;  %v931_v15 = vld [vmem:[#allocation2 + $0x710] sm:$0xff]  ;;  %v5302_v11 = vld [vmem:[%s6865_s7 + $0xa4] ss:$8 sps:$4 sm:$0xff]  }
 0x27b   :  { %2578 = vmatprep.subr.bf16.mxu0 %v4756_v16  ;;  %v935_v16 = vld [vmem:[#allocation2 + $0x730] sm:$0xff] }
 0x27c   :  { %v4817_v27 = vcombine.low %v931_v15, %v935_v16  ;;  %v5297_v8 = vld [vmem:[%s6865_s7 + $0x90] ss:$8 sps:$4 sm:$0xff]  }
 0x27d   :  { %2497 = vmatpush1.bf16.msra.mxu1 %v4753_v21  ;;  %v4818_v21 = vcombine.high %v931_v15, %v935_v16  ;;  %v5306_v15 = vld [vmem:[%s6865_s7 + $0xc0] ss:$8 sps:$4 sm:$0xff]   ;;  %v5311_v16 = vld [vmem:[%s6865_s7 + $0xd4] ss:$8 sps:$4 sm:$0xff]  }
 0x27e   :  { %2579 = vmatpush1.bf16.msra.mxu0 %v4755_v22  ;;  %2498 = vmatprep.subr.bf16.mxu1 %v4762_v23  ;;  %v4820_v22 = vcombine.high %v932_v18, %v936_v19  ;;  %v939_v23 = vld [vmem:[#allocation2 + $0x750] sm:$0xff]  ;;  %v5314_v19 = vld [vmem:[%s6865_s7 + $0xe4] ss:$8 sps:$4 sm:$0xff]  }
 0x27f   :  { %2580 = vmatprep.subr.bf16.mxu0 %v4764_v24  ;;  %v943_v24 = vld [vmem:[#allocation2 + $0x770] sm:$0xff] }
 0x280   :  { %v4825_v38 = vcombine.low %v939_v23, %v943_v24  ;;  %v5309_v18 = vld [vmem:[%s6865_s7 + $0xd0] ss:$8 sps:$4 sm:$0xff]  }
 0x281   :  { %2499 = vmatpush1.bf16.msra.mxu1 %v4761_v56  ;;  %v4826_v56 = vcombine.high %v939_v23, %v943_v24  ;;  %v6165_v23 = vld [vmem:[%s6864_s6] sm:$0xff] }
 0x282   :  { %2581 = vmatpush1.bf16.msra.mxu0 %v4763_v32  ;;  %2500 = vmatprep.subr.bf16.mxu1 %v4770_v33  ;;  %v4828_v32 = vcombine.high %v940_v25, %v944_v26  ;;  %v947_v33 = vld [vmem:[#allocation2 + $0x790] sm:$0xff]  ;;  %v966_v24 = vrot.slane %v6165_v23, %v6007_v29  ;;  %v970_v25 = vrot.slane %v6165_v23, %v6013_v31 }
 0x283   :  { %2582 = vmatprep.subr.bf16.mxu0 %v4772_v35  ;;  %v951_v35 = vld [vmem:[#allocation2 + $0x7b0] sm:$0xff]  ;;  %v978_v26 = vrot.slane %v6165_v23, %v6023_v51 }
 0x284   :  { %v4833_v46 = vcombine.low %v947_v33, %v951_v35 }
 0x285   :  { %2501 = vmatpush1.bf16.msra.mxu1 %v4769_v40  ;;  %v4834_v40 = vcombine.high %v947_v33, %v951_v35 }
 0x286   :  { %2583 = vmatpush1.bf16.msra.mxu0 %v4771_v41  ;;  %2502 = vmatprep.subr.bf16.mxu1 %v4778_v42  ;;  %v4836_v41 = vcombine.high %v948_v36, %v952_v37  ;;  %v955_v42 = vld [vmem:[#allocation2 + $0x7d0] sm:$0xff] }
 0x287   :  { %2584 = vmatprep.subr.bf16.mxu0 %v4780_v43  ;;  %v959_v43 = vld [vmem:[#allocation2 + $0x7f0] sm:$0xff] }
 0x289   :  { %2503 = vmatpush1.bf16.msra.mxu1 %v4777_v48  ;;  %v4842_v48 = vcombine.high %v955_v42, %v959_v43 }
 0x28a   :  { %2585 = vmatpush1.bf16.msra.mxu0 %v4779_v49  ;;  %2504 = vmatprep.subr.bf16.mxu1 %v4786_v52  ;;  %v4844_v49 = vcombine.high %v956_v44, %v960_v45  ;;  %v4841_v52 = vcombine.low %v955_v42, %v959_v43 }
 0x28b   :  { %2586 = vmatprep.subr.bf16.mxu0 %v4788_v53  ;;  %v4843_v53 = vcombine.low %v956_v44, %v960_v45  ;;  %v5318_v45 = vld [vmem:[%s6865_s7 + $0x100] ss:$8 sps:$4 sm:$0xff]  }
 0x28d   :  { %2505 = vmatpush1.bf16.msra.mxu1 %v4785_v9  ;;  %v5278_v9 = vld [vmem:[%s6865_s7 + $0x24] ss:$8 sps:$4 sm:$0xff]  }
 0x28e   :  { %2587 = vmatpush1.bf16.msra.mxu0 %v4787_v60  ;;  %2506 = vmatprep.subr.bf16.mxu1 %v4794_v61  ;;  %v5276_v60 = vld [vmem:[%s6865_s7 + $0x20] ss:$8 sps:$4 sm:$0xff]   ;;  %v5279_v61 = vld [vmem:[%s6865_s7 + $0x30] ss:$8 sps:$4 sm:$0xff]  }
 0x28f   :  { %2588 = vmatprep.subr.bf16.mxu0 %v4796_v62  ;;  %v5284_v62 = vld [vmem:[%s6865_s7 + $0x44] ss:$8 sps:$4 sm:$0xff]  }
 0x291   :  { %2507 = vmatpush1.bf16.msra.mxu1 %v4793_v3  ;;  %v5288_v3 = vld [vmem:[%s6865_s7 + $0x60] ss:$8 sps:$4 sm:$0xff]  }
 0x292   :  { %2589 = vmatpush1.bf16.msra.mxu0 %v4795_v4  ;;  %2508 = vmatprep.subr.bf16.mxu1 %v4802_v5  ;;  %v5293_v4 = vld [vmem:[%s6865_s7 + $0x74] ss:$8 sps:$4 sm:$0xff]   ;;  %v5291_v5 = vld [vmem:[%s6865_s7 + $0x70] ss:$8 sps:$4 sm:$0xff]  }
 0x293   :  { %2590 = vmatprep.subr.bf16.mxu0 %v4804_v10  ;;  %v5296_v10 = vld [vmem:[%s6865_s7 + $0x84] ss:$8 sps:$4 sm:$0xff]  }
 0x295   :  { %2509 = vmatpush1.bf16.msra.mxu1 %v4801_v12  ;;  %v5300_v12 = vld [vmem:[%s6865_s7 + $0xa0] ss:$8 sps:$4 sm:$0xff]  }
 0x296   :  { %2591 = vmatpush1.bf16.msra.mxu0 %v4803_v13  ;;  %2510 = vmatprep.subr.bf16.mxu1 %v4810_v17  ;;  %v5305_v13 = vld [vmem:[%s6865_s7 + $0xb4] ss:$8 sps:$4 sm:$0xff]   ;;  %v5303_v17 = vld [vmem:[%s6865_s7 + $0xb0] ss:$8 sps:$4 sm:$0xff]  }
 0x297   :  { %2592 = vmatprep.subr.bf16.mxu0 %v4812_v14  ;;  %v5308_v14 = vld [vmem:[%s6865_s7 + $0xc4] ss:$8 sps:$4 sm:$0xff]  }
 0x299   :  { %2511 = vmatpush1.bf16.msra.mxu1 %v4809_v50  ;;  %v5312_v50 = vld [vmem:[%s6865_s7 + $0xe0] ss:$8 sps:$4 sm:$0xff]  }
 0x29a   :  { %2593 = vmatpush1.bf16.msra.mxu0 %v4811_v20  ;;  %2512 = vmatprep.subr.bf16.mxu1 %v4818_v21  ;;  %v5317_v20 = vld [vmem:[%s6865_s7 + $0xf4] ss:$8 sps:$4 sm:$0xff]   ;;  %v5315_v21 = vld [vmem:[%s6865_s7 + $0xf0] ss:$8 sps:$4 sm:$0xff]  }
 0x29b   :  { %2594 = vmatprep.subr.bf16.mxu0 %v4820_v22  ;;  %v5320_v22 = vld [vmem:[%s6865_s7 + $0x104] ss:$8 sps:$4 sm:$0xff]  }
 0x29d   :  { %2513 = vmatpush1.bf16.msra.mxu1 %v4817_v27 }
 0x29e   :  { %2595 = vmatpush1.bf16.msra.mxu0 %v4819_v30  ;;  %2514 = vmatprep.subr.bf16.mxu1 %v4826_v56 }
 0x29f   :  { %2596 = vmatprep.subr.bf16.mxu0 %v4828_v32 }
 0x2a1   :  { %2515 = vmatpush1.bf16.msra.mxu1 %v4825_v38 }
 0x2a2   :  { %2597 = vmatpush1.bf16.msra.mxu0 %v4827_v39  ;;  %2516 = vmatprep.subr.bf16.mxu1 %v4834_v40 }
 0x2a3   :  { %2598 = vmatprep.subr.bf16.mxu0 %v4836_v41 }
 0x2a5   :  { %2517 = vmatpush1.bf16.msra.mxu1 %v4833_v46 }
 0x2a6   :  { %2599 = vmatpush1.bf16.msra.mxu0 %v4835_v47  ;;  %2518 = vmatprep.subr.bf16.mxu1 %v4842_v48  ;;  %v5323_v47 = vld [vmem:[%s6865_s7 + $0x114] ss:$8 sps:$4 sm:$0xff]  }
 0x2a7   :  { %2600 = vmatprep.subr.bf16.mxu0 %v4844_v49  ;;  %v5321_v49 = vld [vmem:[%s6865_s7 + $0x110] ss:$8 sps:$4 sm:$0xff]  }
 0x2a9   :  { %2519 = vmatpush1.bf16.msra.mxu1 %v4841_v52  ;;  %v5326_v52 = vld [vmem:[%s6865_s7 + $0x124] ss:$8 sps:$4 sm:$0xff]  }
 0x2aa   :  { %2601 = vmatpush1.bf16.msra.mxu0 %v4843_v53  ;;  %3407 = vmatprep.subr.bf16.mxu1 %v5272_v54  ;;  %v5324_v53 = vld [vmem:[%s6865_s7 + $0x120] ss:$8 sps:$4 sm:$0xff]   ;;  %v5329_v54 = vld [vmem:[%s6865_s7 + $0x134] ss:$8 sps:$4 sm:$0xff]  }
 0x2ac   :  { %2521 = vmatmul.mubr.bf16.vlgmr.msra.gmra.mrb[8].mxu1 %v6051_v34 }
 0x2ad   :  { %2603 = vmatmul.mubr.bf16.vlgmr.msra.gmra.mrb[12].mxu0 %v6051_v34  ;;  %3408 = vmatpush1.bf16.msra.mxu1 %v5270_v55  ;;  %v5281_v34 = vld [vmem:[%s6865_s7 + $0x34] ss:$8 sps:$4 sm:$0xff]   ;;  %v5327_v55 = vld [vmem:[%s6865_s7 + $0x130] ss:$8 sps:$4 sm:$0xff]  }
 0x2ae   :  { %3409 = vmatprep.subr.bf16.mxu1 %v5275_v57  ;;  %v5332_v57 = vld [vmem:[%s6865_s7 + $0x144] ss:$8 sps:$4 sm:$0xff]  }
 0x2b1   :  { %3410 = vmatpush1.bf16.msra.mxu1 %v5273_v58  ;;  %v5330_v58 = vld [vmem:[%s6865_s7 + $0x140] ss:$8 sps:$4 sm:$0xff]  }
 0x2b2   :  { %3411 = vmatprep.subr.bf16.mxu1 %v5278_v9  ;;  %v5335_v9 = vld [vmem:[%s6865_s7 + $0x154] ss:$8 sps:$4 sm:$0xff]  }
 0x2b5   :  { %3412 = vmatpush1.bf16.msra.mxu1 %v5276_v60  ;;  %v5333_v60 = vld [vmem:[%s6865_s7 + $0x150] ss:$8 sps:$4 sm:$0xff]  }
 0x2b6   :  { %3413 = vmatprep.subr.bf16.mxu1 %v5281_v34  ;;  %v5338_v34 = vld [vmem:[%s6865_s7 + $0x164] ss:$8 sps:$4 sm:$0xff]  }
 0x2b9   :  { %3414 = vmatpush1.bf16.msra.mxu1 %v5279_v61  ;;  %v5336_v61 = vld [vmem:[%s6865_s7 + $0x160] ss:$8 sps:$4 sm:$0xff]  }
 0x2ba   :  { %3415 = vmatprep.subr.bf16.mxu1 %v5284_v62  ;;  %v5341_v62 = vld [vmem:[%s6865_s7 + $0x174] ss:$8 sps:$4 sm:$0xff]  }
 0x2bd   :  { %3416 = vmatpush1.bf16.msra.mxu1 %v5282_v63  ;;  %v5339_v63 = vld [vmem:[%s6865_s7 + $0x170] ss:$8 sps:$4 sm:$0xff]  }
 0x2be   :  { %3417 = vmatprep.subr.bf16.mxu1 %v5287_v0  ;;  %v5344_v0 = vld [vmem:[%s6865_s7 + $0x184] ss:$8 sps:$4 sm:$0xff]  }
 0x2c1   :  { %3418 = vmatpush1.bf16.msra.mxu1 %v5285_v1  ;;  %v5342_v1 = vld [vmem:[%s6865_s7 + $0x180] ss:$8 sps:$4 sm:$0xff]  }
 0x2c2   :  { %3419 = vmatprep.subr.bf16.mxu1 %v5290_v2  ;;  %v5347_v2 = vld [vmem:[%s6865_s7 + $0x194] ss:$8 sps:$4 sm:$0xff]  }
 0x2c5   :  { %3420 = vmatpush1.bf16.msra.mxu1 %v5288_v3  ;;  %v5345_v3 = vld [vmem:[%s6865_s7 + $0x190] ss:$8 sps:$4 sm:$0xff]  }
 0x2c6   :  { %3421 = vmatprep.subr.bf16.mxu1 %v5293_v4  ;;  %v5350_v4 = vld [vmem:[%s6865_s7 + $0x1a4] ss:$8 sps:$4 sm:$0xff]  }
 0x2c9   :  { %3422 = vmatpush1.bf16.msra.mxu1 %v5291_v5  ;;  %v5348_v5 = vld [vmem:[%s6865_s7 + $0x1a0] ss:$8 sps:$4 sm:$0xff]  }
 0x2ca   :  { %3423 = vmatprep.subr.bf16.mxu1 %v5296_v10  ;;  %v5353_v10 = vld [vmem:[%s6865_s7 + $0x1b4] ss:$8 sps:$4 sm:$0xff]  }
 0x2cd   :  { %3424 = vmatpush1.bf16.msra.mxu1 %v5294_v6  ;;  %v5351_v6 = vld [vmem:[%s6865_s7 + $0x1b0] ss:$8 sps:$4 sm:$0xff]  }
 0x2ce   :  { %3425 = vmatprep.subr.bf16.mxu1 %v5299_v7  ;;  %v5356_v7 = vld [vmem:[%s6865_s7 + $0x1c4] ss:$8 sps:$4 sm:$0xff]  }
 0x2d1   :  { %3426 = vmatpush1.bf16.msra.mxu1 %v5297_v8  ;;  %v5354_v8 = vld [vmem:[%s6865_s7 + $0x1c0] ss:$8 sps:$4 sm:$0xff]  }
 0x2d2   :  { %3427 = vmatprep.subr.bf16.mxu1 %v5302_v11  ;;  %v5359_v11 = vld [vmem:[%s6865_s7 + $0x1d4] ss:$8 sps:$4 sm:$0xff]  }
 0x2d5   :  { %3428 = vmatpush1.bf16.msra.mxu1 %v5300_v12  ;;  %v5357_v12 = vld [vmem:[%s6865_s7 + $0x1d0] ss:$8 sps:$4 sm:$0xff]  }
 0x2d6   :  { %3429 = vmatprep.subr.bf16.mxu1 %v5305_v13  ;;  %v974_v13 = vrot.slane %v6165_v23, %v6046_v59 }
 0x2d9   :  { %3430 = vmatpush1.bf16.msra.mxu1 %v5303_v17  ;;  %v5362_v17 = vld [vmem:[%s6865_s7 + $0x1e4] ss:$8 sps:$4 sm:$0xff]  }
 0x2da   :  { %3431 = vmatprep.subr.bf16.mxu1 %v5308_v14  ;;  %v5360_v14 = vld [vmem:[%s6865_s7 + $0x1e0] ss:$8 sps:$4 sm:$0xff]  }
 0x2dd   :  { %3432 = vmatpush1.bf16.msra.mxu1 %v5306_v15 }
 0x2de   :  { %3433 = vmatprep.subr.bf16.mxu1 %v5311_v16  ;;  %v5365_v16 = vld [vmem:[%s6865_s7 + $0x1f4] ss:$8 sps:$4 sm:$0xff]  }
 0x2e1   :  { %3434 = vmatpush1.bf16.msra.mxu1 %v5309_v18  ;;  %v5363_v18 = vld [vmem:[%s6865_s7 + $0x1f0] ss:$8 sps:$4 sm:$0xff]  }
 0x2e2   :  { %3435 = vmatprep.subr.bf16.mxu1 %v5314_v19 }
 0x2e5   :  { %3436 = vmatpush1.bf16.msra.mxu1 %v5312_v50  ;;  %v5368_v50 = vld [vmem:[%s6865_s7 + $0x204] ss:$8 sps:$4 sm:$0xff]  }
 0x2e6   :  { %3437 = vmatprep.subr.bf16.mxu1 %v5317_v20  ;;  %v5366_v20 = vld [vmem:[%s6865_s7 + $0x200] ss:$8 sps:$4 sm:$0xff]  }
 0x2e9   :  { %3438 = vmatpush1.bf16.msra.mxu1 %v5315_v21 }
 0x2ea   :  { %3448 = vmatprep.subr.bf16.mxu1 %v5320_v22  ;;  %v5371_v22 = vld [vmem:[%s6865_s7 + $0x214] ss:$8 sps:$4 sm:$0xff]  }
 0x2ff   :  { %v2358_v27 = vpop.f32.mrb[4].mxu1  ;;  %v6173_v30 = vpop.f32.mrb[8].mxu0 }
 0x300   :  { %v5107_v56 = vadd.f32 %v2358_v27, %v966_v24  ;;  %v2360_v32 = vpop.f32.mrb[5].mxu1  ;;  %v2442_v33 = vpop.f32.mrb[9].mxu0  ;;  %v5109_v15 = vadd.f32 %v6173_v30, %v974_v13  ;;  %v5462_v24 = vld [vmem:[%s6867_s9] ss:$28 sps:$4 sm:$0xff]   ;;  %v5374_v30 = vld [vmem:[%s6865_s7 + $0x224] ss:$8 sps:$4 sm:$0xff]  }
 0x301   :  { %v5108_v35 = vadd.f32 %v2360_v32, %v970_v25  ;;  %v5110_v36 = vadd.f32 %v2442_v33, %v978_v26  ;;  %v2362_v37 = vpop.f32.mrb[6].mxu1  ;;  %v2444_v38 = vpop.f32.mrb[10].mxu0  ;;  %v5464_v25 = vld [vmem:[%s6867_s9 + $0x4] ss:$28 sps:$4 sm:$0xff]   ;;  %v5369_v26 = vld [vmem:[%s6865_s7 + $0x210] ss:$8 sps:$4 sm:$0xff]  }
 0x302   :  { %v2611_v39 = vmax.f32 %v5107_v56, 0.0  ;;  %v2363_v40 = vpop.f32.mrb[7].mxu1  ;;  %v2445_v41 = vpop.f32.mrb[11].mxu0  ;;  %v2613_v19 = vmax.f32 %v5109_v15, 0.0  ;;  %v5467_v27 = vld [vmem:[%s6867_s9 + $0x3c] ss:$28 sps:$4 sm:$0xff]   ;;  %4316 = vmatprep.subr.bf16.mxu0 %v5464_v25 }
 0x303   :  { %v2612_v42 = vmax.f32 %v5108_v35, 0.0  ;;  %v2614_v43 = vmax.f32 %v5110_v36, 0.0  ;;  %4317 = vmatpush1.bf16.msra.mxu0 %v5462_v24  ;;  %v5465_v56 = vld [vmem:[%s6867_s9 + $0x38] ss:$28 sps:$4 sm:$0xff]   ;;  %v5372_v33 = vld [vmem:[%s6865_s7 + $0x220] ss:$8 sps:$4 sm:$0xff]  }
 0x304   :  { %v2619_v46 = vpack.c.bf16 %v2611_v39, %v2611_v39  ;;  %v2621_v21 = vpack.c.bf16 %v2613_v19, %v2613_v19  ;;  %4318 = vmatprep.subr.bf16.mxu0 %v5467_v27  ;;  %v5470_v32 = vld [vmem:[%s6867_s9 + $0x74] ss:$28 sps:$4 sm:$0xff]   ;;  %v5473_v37 = vld [vmem:[%s6867_s9 + $0xac] ss:$28 sps:$4 sm:$0xff]   ;;  %v5476_v41 = vld [vmem:[%s6867_s9 + $0xe4] ss:$28 sps:$4 sm:$0xff]  }
 0x305   :  { %v2620_v44 = vpack.c.bf16 %v2612_v42, %v2612_v42  ;;  %v2622_v48 = vpack.c.bf16 %v2614_v43, %v2614_v43  ;;  %v5377_v35 = vld [vmem:[%s6865_s7 + $0x234] ss:$8 sps:$4 sm:$0xff]   ;;  %v5468_v36 = vld [vmem:[%s6867_s9 + $0x70] ss:$28 sps:$4 sm:$0xff]   ;;  %v5471_v40 = vld [vmem:[%s6867_s9 + $0xa8] ss:$28 sps:$4 sm:$0xff]  }
 0x306   :  { %v5375_v38 = vld [vmem:[%s6865_s7 + $0x230] ss:$8 sps:$4 sm:$0xff]   ;;  %v5380_v39 = vld [vmem:[%s6865_s7 + $0x244] ss:$8 sps:$4 sm:$0xff]   ;;  %v5378_v42 = vld [vmem:[%s6865_s7 + $0x240] ss:$8 sps:$4 sm:$0xff]  }
 0x307   :  { %3439 = vmatprep.mubr.bf16.mxu1 %v2620_v44  ;;  %4319 = vmatpush1.bf16.msra.mxu0 %v5465_v56  ;;  %v5383_v43 = vld [vmem:[%s6865_s7 + $0x254] ss:$8 sps:$4 sm:$0xff]   ;;  %v5402_v13 = vld [vmem:[%s6865_s7 + $0x2c0] ss:$8 sps:$4 sm:$0xff]   ;;  %v981_v15 = vsub.s32 4, %v6004_v28  ;;  %v985_v19 = vsub.s32 5, %v6004_v28 }
 0x308   :  { %3440 = vmatmul.mubr.bf16.vlgmr.msra.gmra.mrb[12].mxu1 %v2619_v46  ;;  %4320 = vmatprep.subr.bf16.mxu0 %v5470_v32  ;;  %v5474_v44 = vld [vmem:[%s6867_s9 + $0xe0] ss:$28 sps:$4 sm:$0xff]   ;;  %v5381_v46 = vld [vmem:[%s6865_s7 + $0x250] ss:$8 sps:$4 sm:$0xff]  }
 0x309   :  { %3449 = vmatpush1.bf16.msra.mxu1 %v5318_v45  ;;  %3480 = vmatprep.mubr.bf16.mxu1 %v2622_v48  ;;  %v5479_v45 = vld [vmem:[%s6867_s9 + $0x11c] ss:$28 sps:$4 sm:$0xff]   ;;  %v5408_v24 = vld [vmem:[%s6865_s7 + $0x2e0] ss:$8 sps:$4 sm:$0xff]   ;;  %v986_v25 = vrot.slane %v6165_v23, %v985_v19 }
 0x30a   :  { %3450 = vmatprep.subr.bf16.mxu1 %v5323_v47  ;;  %v5386_v47 = vld [vmem:[%s6865_s7 + $0x264] ss:$8 sps:$4 sm:$0xff]   ;;  %v5477_v48 = vld [vmem:[%s6867_s9 + $0x118] ss:$28 sps:$4 sm:$0xff]  }
 0x30b   :  { %4321 = vmatpush1.bf16.msra.mxu0 %v5468_v36  ;;  %v5413_v27 = vld [vmem:[%s6865_s7 + $0x2f4] ss:$8 sps:$4 sm:$0xff]  }
 0x30c   :  { %4322 = vmatprep.subr.bf16.mxu0 %v5473_v37 }
 0x30d   :  { %3451 = vmatpush1.bf16.msra.mxu1 %v5321_v49  ;;  %v5482_v49 = vld [vmem:[%s6867_s9 + $0x154] ss:$28 sps:$4 sm:$0xff]  }
 0x30e   :  { %3452 = vmatprep.subr.bf16.mxu1 %v5326_v52  ;;  %v5384_v52 = vld [vmem:[%s6865_s7 + $0x260] ss:$8 sps:$4 sm:$0xff]  }
 0x30f   :  { %4323 = vmatpush1.bf16.msra.mxu0 %v5471_v40 }
 0x310   :  { %4324 = vmatprep.subr.bf16.mxu0 %v5476_v41 }
 0x311   :  { %3453 = vmatpush1.bf16.msra.mxu1 %v5324_v53  ;;  %v5389_v53 = vld [vmem:[%s6865_s7 + $0x274] ss:$8 sps:$4 sm:$0xff]  }
 0x312   :  { %3454 = vmatprep.subr.bf16.mxu1 %v5329_v54  ;;  %v5480_v54 = vld [vmem:[%s6867_s9 + $0x150] ss:$28 sps:$4 sm:$0xff]  }
 0x313   :  { %4325 = vmatpush1.bf16.msra.mxu0 %v5474_v44 }
 0x314   :  { %4326 = vmatprep.subr.bf16.mxu0 %v5479_v45 }
 0x315   :  { %3455 = vmatpush1.bf16.msra.mxu1 %v5327_v55  ;;  %v5485_v55 = vld [vmem:[%s6867_s9 + $0x18c] ss:$28 sps:$4 sm:$0xff]  }
 0x316   :  { %3456 = vmatprep.subr.bf16.mxu1 %v5332_v57  ;;  %v5387_v57 = vld [vmem:[%s6865_s7 + $0x270] ss:$8 sps:$4 sm:$0xff]  }
 0x317   :  { %4327 = vmatpush1.bf16.msra.mxu0 %v5477_v48  ;;  %v5414_v48 = vld [vmem:[%s6865_s7 + $0x300] ss:$8 sps:$4 sm:$0xff]  }
 0x318   :  { %4328 = vmatprep.subr.bf16.mxu0 %v5482_v49 }
 0x319   :  { %3457 = vmatpush1.bf16.msra.mxu1 %v5330_v58  ;;  %v5392_v58 = vld [vmem:[%s6865_s7 + $0x284] ss:$8 sps:$4 sm:$0xff]  }
 0x31a   :  { %3458 = vmatprep.subr.bf16.mxu1 %v5335_v9  ;;  %v5483_v9 = vld [vmem:[%s6867_s9 + $0x188] ss:$28 sps:$4 sm:$0xff]  }
 0x31b   :  { %4329 = vmatpush1.bf16.msra.mxu0 %v5480_v54  ;;  %v5417_v54 = vld [vmem:[%s6865_s7 + $0x310] ss:$8 sps:$4 sm:$0xff]  }
 0x31c   :  { %4330 = vmatprep.subr.bf16.mxu0 %v5485_v55  ;;  %v5422_v55 = vld [vmem:[%s6865_s7 + $0x324] ss:$8 sps:$4 sm:$0xff]  }
 0x31d   :  { %3459 = vmatpush1.bf16.msra.mxu1 %v5333_v60  ;;  %v5488_v60 = vld [vmem:[%s6867_s9 + $0x1c4] ss:$28 sps:$4 sm:$0xff]  }
 0x31e   :  { %3460 = vmatprep.subr.bf16.mxu1 %v5338_v34  ;;  %v5390_v34 = vld [vmem:[%s6865_s7 + $0x280] ss:$8 sps:$4 sm:$0xff]  }
 0x31f   :  { %4331 = vmatpush1.bf16.msra.mxu0 %v5483_v9  ;;  %v5423_v9 = vld [vmem:[%s6865_s7 + $0x330] ss:$8 sps:$4 sm:$0xff]  }
 0x320   :  { %4332 = vmatprep.subr.bf16.mxu0 %v5488_v60  ;;  %v5428_v60 = vld [vmem:[%s6865_s7 + $0x344] ss:$8 sps:$4 sm:$0xff]  }
 0x321   :  { %3461 = vmatpush1.bf16.msra.mxu1 %v5336_v61  ;;  %v5395_v61 = vld [vmem:[%s6865_s7 + $0x294] ss:$8 sps:$4 sm:$0xff]  }
 0x322   :  { %3462 = vmatprep.subr.bf16.mxu1 %v5341_v62  ;;  %v5486_v62 = vld [vmem:[%s6867_s9 + $0x1c0] ss:$28 sps:$4 sm:$0xff]  }
 0x323   :  { %4333 = vmatpush1.bf16.msra.mxu0 %v5486_v62  ;;  %v5429_v62 = vld [vmem:[%s6865_s7 + $0x350] ss:$8 sps:$4 sm:$0xff]  }
 0x325   :  { %3463 = vmatpush1.bf16.msra.mxu1 %v5339_v63  ;;  %v5491_v63 = vld [vmem:[%s6867_s9 + $0x1fc] ss:$28 sps:$4 sm:$0xff]  }
 0x326   :  { %3464 = vmatprep.subr.bf16.mxu1 %v5344_v0  ;;  %v5393_v0 = vld [vmem:[%s6865_s7 + $0x290] ss:$8 sps:$4 sm:$0xff]   ;;  %4334 = vmatprep.subr.bf16.mxu0 %v5491_v63  ;;  %v5434_v63 = vld [vmem:[%s6865_s7 + $0x364] ss:$8 sps:$4 sm:$0xff]  }
 0x329   :  { %3465 = vmatpush1.bf16.msra.mxu1 %v5342_v1  ;;  %v5398_v1 = vld [vmem:[%s6865_s7 + $0x2a4] ss:$8 sps:$4 sm:$0xff]  }
 0x32a   :  { %3466 = vmatprep.subr.bf16.mxu1 %v5347_v2  ;;  %v5489_v2 = vld [vmem:[%s6867_s9 + $0x1f8] ss:$28 sps:$4 sm:$0xff]  }
 0x32b   :  { %4335 = vmatpush1.bf16.msra.mxu0 %v5489_v2  ;;  %v5435_v2 = vld [vmem:[%s6865_s7 + $0x370] ss:$8 sps:$4 sm:$0xff]  }
 0x32d   :  { %3467 = vmatpush1.bf16.msra.mxu1 %v5345_v3  ;;  %v5494_v3 = vld [vmem:[%s6867_s9 + $0x234] ss:$28 sps:$4 sm:$0xff]  }
 0x32e   :  { %3468 = vmatprep.subr.bf16.mxu1 %v5350_v4  ;;  %v5396_v4 = vld [vmem:[%s6865_s7 + $0x2a0] ss:$8 sps:$4 sm:$0xff]   ;;  %4336 = vmatprep.subr.bf16.mxu0 %v5494_v3  ;;  %v5440_v3 = vld [vmem:[%s6865_s7 + $0x384] ss:$8 sps:$4 sm:$0xff]  }
 0x331   :  { %3469 = vmatpush1.bf16.msra.mxu1 %v5348_v5  ;;  %v5401_v5 = vld [vmem:[%s6865_s7 + $0x2b4] ss:$8 sps:$4 sm:$0xff]  }
 0x332   :  { %3470 = vmatprep.subr.bf16.mxu1 %v5353_v10  ;;  %v5492_v10 = vld [vmem:[%s6867_s9 + $0x230] ss:$28 sps:$4 sm:$0xff]  }
 0x333   :  { %4337 = vmatpush1.bf16.msra.mxu0 %v5492_v10  ;;  %v5441_v10 = vld [vmem:[%s6865_s7 + $0x390] ss:$8 sps:$4 sm:$0xff]  }
 0x335   :  { %3471 = vmatpush1.bf16.msra.mxu1 %v5351_v6  ;;  %v5497_v6 = vld [vmem:[%s6867_s9 + $0x26c] ss:$28 sps:$4 sm:$0xff]  }
 0x336   :  { %3472 = vmatprep.subr.bf16.mxu1 %v5356_v7  ;;  %v5399_v7 = vld [vmem:[%s6865_s7 + $0x2b0] ss:$8 sps:$4 sm:$0xff]   ;;  %4338 = vmatprep.subr.bf16.mxu0 %v5497_v6  ;;  %v5446_v6 = vld [vmem:[%s6865_s7 + $0x3a4] ss:$8 sps:$4 sm:$0xff]  }
 0x339   :  { %3473 = vmatpush1.bf16.msra.mxu1 %v5354_v8  ;;  %v5404_v8 = vld [vmem:[%s6865_s7 + $0x2c4] ss:$8 sps:$4 sm:$0xff]  }
 0x33a   :  { %3474 = vmatprep.subr.bf16.mxu1 %v5359_v11  ;;  %v5495_v11 = vld [vmem:[%s6867_s9 + $0x268] ss:$28 sps:$4 sm:$0xff]  }
 0x33b   :  { %4339 = vmatpush1.bf16.msra.mxu0 %v5495_v11  ;;  %v5447_v11 = vld [vmem:[%s6865_s7 + $0x3b0] ss:$8 sps:$4 sm:$0xff]  }
 0x33d   :  { %3475 = vmatpush1.bf16.msra.mxu1 %v5357_v12  ;;  %v5500_v12 = vld [vmem:[%s6867_s9 + $0x2a4] ss:$28 sps:$4 sm:$0xff]  }
 0x33e   :  { %3476 = vmatprep.subr.bf16.mxu1 %v5362_v17  ;;  %v5407_v17 = vld [vmem:[%s6865_s7 + $0x2d4] ss:$8 sps:$4 sm:$0xff]   ;;  %4340 = vmatprep.subr.bf16.mxu0 %v5500_v12  ;;  %v5452_v12 = vld [vmem:[%s6865_s7 + $0x3c4] ss:$8 sps:$4 sm:$0xff]  }
 0x341   :  { %3477 = vmatpush1.bf16.msra.mxu1 %v5360_v14  ;;  %v5498_v14 = vld [vmem:[%s6867_s9 + $0x2a0] ss:$28 sps:$4 sm:$0xff]  }
 0x342   :  { %3478 = vmatprep.subr.bf16.mxu1 %v5365_v16  ;;  %v5503_v16 = vld [vmem:[%s6867_s9 + $0x2dc] ss:$28 sps:$4 sm:$0xff]   ;;  %4341 = vmatpush1.bf16.msra.mxu0 %v5498_v14 }
 0x343   :  { %4342 = vmatprep.subr.bf16.mxu0 %v5503_v16  ;;  %v5455_v14 = vld [vmem:[%s6865_s7 + $0x3d4] ss:$8 sps:$4 sm:$0xff]   ;;  %v5453_v16 = vld [vmem:[%s6865_s7 + $0x3d0] ss:$8 sps:$4 sm:$0xff]  }
 0x345   :  { %3479 = vmatpush1.bf16.msra.mxu1 %v5363_v18  ;;  %v5405_v18 = vld [vmem:[%s6865_s7 + $0x2d0] ss:$8 sps:$4 sm:$0xff]  }
 0x346   :  { %3489 = vmatprep.subr.bf16.mxu1 %v5368_v50  ;;  %v5410_v50 = vld [vmem:[%s6865_s7 + $0x2e4] ss:$8 sps:$4 sm:$0xff]  }
 0x348   :  { %3481 = vmatmul.mubr.bf16.vlgmr.msra.gmra.mrb[12].mxu1 %v2621_v21  ;;  %v5501_v21 = vld [vmem:[%s6867_s9 + $0x2d8] ss:$28 sps:$4 sm:$0xff]  }
 0x349   :  { %3490 = vmatpush1.bf16.msra.mxu1 %v5366_v20  ;;  %v993_v20 = vsub.s32 7, %v6004_v28  ;;  %4343 = vmatpush1.bf16.msra.mxu0 %v5501_v21 }
 0x34a   :  { %3491 = vmatprep.subr.bf16.mxu1 %v5371_v22  ;;  %v982_v22 = vrot.slane %v6165_v23, %v981_v15 }
 0x34d   :  { %3492 = vmatpush1.bf16.msra.mxu1 %v5369_v26  ;;  %v994_v26 = vrot.slane %v6165_v23, %v993_v20  ;;  %v5456_v20 = vld [vmem:[%s6865_s7 + $0x3e0] ss:$8 sps:$4 sm:$0xff]  }
 0x34e   :  { %3493 = vmatprep.subr.bf16.mxu1 %v5374_v30 }
 0x351   :  { %3494 = vmatpush1.bf16.msra.mxu1 %v5372_v33 }
 0x352   :  { %3495 = vmatprep.subr.bf16.mxu1 %v5377_v35 }
 0x355   :  { %3496 = vmatpush1.bf16.msra.mxu1 %v5375_v38  ;;  %v5411_v38 = vld [vmem:[%s6865_s7 + $0x2f0] ss:$8 sps:$4 sm:$0xff]  }
 0x356   :  { %3497 = vmatprep.subr.bf16.mxu1 %v5380_v39 }
 0x359   :  { %3498 = vmatpush1.bf16.msra.mxu1 %v5378_v42 }
 0x35a   :  { %3499 = vmatprep.subr.bf16.mxu1 %v5383_v43  ;;  %v5416_v43 = vld [vmem:[%s6865_s7 + $0x304] ss:$8 sps:$4 sm:$0xff]  }
 0x35d   :  { %3500 = vmatpush1.bf16.msra.mxu1 %v5381_v46 }
 0x35e   :  { %3501 = vmatprep.subr.bf16.mxu1 %v5386_v47 }
 0x361   :  { %3502 = vmatpush1.bf16.msra.mxu1 %v5384_v52  ;;  %v5419_v52 = vld [vmem:[%s6865_s7 + $0x314] ss:$8 sps:$4 sm:$0xff]  }
 0x362   :  { %3503 = vmatprep.subr.bf16.mxu1 %v5389_v53 }
 0x365   :  { %3504 = vmatpush1.bf16.msra.mxu1 %v5387_v57  ;;  %v5420_v57 = vld [vmem:[%s6865_s7 + $0x320] ss:$8 sps:$4 sm:$0xff]  }
 0x366   :  { %3505 = vmatprep.subr.bf16.mxu1 %v5392_v58  ;;  %v5425_v58 = vld [vmem:[%s6865_s7 + $0x334] ss:$8 sps:$4 sm:$0xff]  }
 0x369   :  { %3506 = vmatpush1.bf16.msra.mxu1 %v5390_v34  ;;  %v5426_v34 = vld [vmem:[%s6865_s7 + $0x340] ss:$8 sps:$4 sm:$0xff]  }
 0x36a   :  { %3507 = vmatprep.subr.bf16.mxu1 %v5395_v61  ;;  %v5431_v61 = vld [vmem:[%s6865_s7 + $0x354] ss:$8 sps:$4 sm:$0xff]  }
 0x36d   :  { %3508 = vmatpush1.bf16.msra.mxu1 %v5393_v0  ;;  %v5432_v0 = vld [vmem:[%s6865_s7 + $0x360] ss:$8 sps:$4 sm:$0xff]  }
 0x36e   :  { %3509 = vmatprep.subr.bf16.mxu1 %v5398_v1  ;;  %v5437_v1 = vld [vmem:[%s6865_s7 + $0x374] ss:$8 sps:$4 sm:$0xff]  }
 0x371   :  { %3510 = vmatpush1.bf16.msra.mxu1 %v5396_v4  ;;  %v5438_v4 = vld [vmem:[%s6865_s7 + $0x380] ss:$8 sps:$4 sm:$0xff]  }
 0x372   :  { %3511 = vmatprep.subr.bf16.mxu1 %v5401_v5  ;;  %v5443_v5 = vld [vmem:[%s6865_s7 + $0x394] ss:$8 sps:$4 sm:$0xff]  }
 0x375   :  { %3512 = vmatpush1.bf16.msra.mxu1 %v5399_v7  ;;  %v5444_v7 = vld [vmem:[%s6865_s7 + $0x3a0] ss:$8 sps:$4 sm:$0xff]  }
 0x376   :  { %3513 = vmatprep.subr.bf16.mxu1 %v5404_v8  ;;  %v5449_v8 = vld [vmem:[%s6865_s7 + $0x3b4] ss:$8 sps:$4 sm:$0xff]  }
 0x379   :  { %3514 = vmatpush1.bf16.msra.mxu1 %v5402_v13  ;;  %v5450_v13 = vld [vmem:[%s6865_s7 + $0x3c0] ss:$8 sps:$4 sm:$0xff]  }
 0x37a   :  { %3515 = vmatprep.subr.bf16.mxu1 %v5407_v17  ;;  %v989_v17 = vsub.s32 6, %v6004_v28 }
 0x37d   :  { %3516 = vmatpush1.bf16.msra.mxu1 %v5405_v18  ;;  %v990_v18 = vrot.slane %v6165_v23, %v989_v17  ;;  %v5459_v23 = vld [vmem:[%s6865_s7 + $0x3f0] ss:$8 sps:$4 sm:$0xff]  }
 0x37e   :  { %3517 = vmatprep.subr.bf16.mxu1 %v5410_v50  ;;  %v5458_v50 = vld [vmem:[%s6865_s7 + $0x3e4] ss:$8 sps:$4 sm:$0xff]  }
 0x37f   :  { %v2522_v30 = vpop.f32.mrb[8].mxu1 }
 0x380   :  { %v5111_v56 = vadd.f32 %v2522_v30, %v982_v22  ;;  %v6458_v32 = vpop.f32.mrb[12].mxu0  ;;  %v2524_v33 = vpop.f32.mrb[9].mxu1  ;;  %v5461_v22 = vld [vmem:[%s6865_s7 + $0x3f4] ss:$8 sps:$4 sm:$0xff]   ;;  %v5509_v30 = vld [vmem:[%s6867_s9 + $0x34c] ss:$28 sps:$4 sm:$0xff]  }
 0x381   :  { %v5112_v35 = vadd.f32 %v2524_v33, %v986_v25  ;;  %v2606_v36 = vpop.f32.mrb[13].mxu0  ;;  %3518 = vmatpush1.bf16.msra.mxu1 %v5408_v24  ;;  %v2526_v37 = vpop.f32.mrb[10].mxu1  ;;  %v5113_v21 = vadd.f32 %v6458_v32, %v990_v18  ;;  %v5512_v32 = vld [vmem:[%s6867_s9 + $0xc] ss:$28 sps:$4 sm:$0xff]   ;;  %v2755_v33 = vld [vmem:[%s6866_s8] sm:$0x3] }
 0x382   :  { %v2615_v39 = vmax.f32 %v5111_v56, 0.0  ;;  %v5114_v40 = vadd.f32 %v2606_v36, %v994_v26  ;;  %v2608_v41 = vpop.f32.mrb[14].mxu0  ;;  %v2527_v42 = vpop.f32.mrb[11].mxu1  ;;  %3519 = vmatprep.subr.bf16.mxu1 %v5413_v27  ;;  %v5506_v26 = vld [vmem:[%s6867_s9 + $0x314] ss:$28 sps:$4 sm:$0xff]   ;;  %v2764_v36 = vrot.slane %v2755_v33, %v6013_v31 }
 0x383   :  { %v2616_v44 = vmax.f32 %v5112_v35, 0.0  ;;  %v2609_v45 = vpop.f32.mrb[15].mxu0  ;;  %v2617_v24 = vmax.f32 %v5113_v21, 0.0  ;;  %v5504_v27 = vld [vmem:[%s6867_s9 + $0x310] ss:$28 sps:$4 sm:$0xff]   ;;  %4344 = vmatprep.subr.bf16.mxu0 %v5506_v26  ;;  %v2760_v35 = vrot.slane %v2755_v33, %v6007_v29 }
 0x384   :  { %v2618_v46 = vmax.f32 %v5114_v40, 0.0  ;;  %v2623_v49 = vpack.c.bf16 %v2615_v39, %v2615_v39  ;;  %4345 = vmatpush1.bf16.msra.mxu0 %v5504_v27  ;;  %v5507_v56 = vld [vmem:[%s6867_s9 + $0x348] ss:$28 sps:$4 sm:$0xff]   ;;  %v5555_v18 = vld [vmem:[%s6867_s9 + $0x350] ss:$28 sps:$4 sm:$0xff]  }
 0x385   :  { %v2624_v47 = vpack.c.bf16 %v2616_v44, %v2616_v44  ;;  %3520 = vmatpush1.bf16.msra.mxu1 %v5411_v38  ;;  %v2625_v25 = vpack.c.bf16 %v2617_v24, %v2617_v24  ;;  %4346 = vmatprep.subr.bf16.mxu0 %v5509_v30  ;;  %v5563_v21 = vld [vmem:[%s6867_s9 + $0x4c] ss:$28 sps:$4 sm:$0xff]   ;;  %v5564_v24 = vld [vmem:[%s6867_s9 + $0x80] ss:$28 sps:$4 sm:$0xff]   ;;  %v5567_v26 = vld [vmem:[%s6867_s9 + $0xb8] ss:$28 sps:$4 sm:$0xff]  }
 0x386   :  { %3530 = vmatprep.subr.bf16.mxu1 %v5416_v43  ;;  %v2626_v53 = vpack.c.bf16 %v2618_v46, %v2618_v46  ;;  %v5510_v46 = vld [vmem:[%s6867_s9 + $0x8] ss:$28 sps:$4 sm:$0xff]   ;;  %v5572_v27 = vld [vmem:[%s6867_s9 + $0xf4] ss:$28 sps:$4 sm:$0xff]  }
 0x387   :  { %3521 = vmatprep.mubr.bf16.mxu1 %v2624_v47  ;;  %v5570_v30 = vld [vmem:[%s6867_s9 + $0xf0] ss:$28 sps:$4 sm:$0xff]   ;;  %v5578_v33 = vld [vmem:[%s6867_s9 + $0x164] ss:$28 sps:$4 sm:$0xff]  }
 0x388   :  { %3522 = vmatmul.mubr.bf16.vlgmr.msra.gmra.mrb[12].mxu1 %v2623_v49  ;;  %4347 = vmatpush1.bf16.msra.mxu0 %v5507_v56  ;;  %v5513_v49 = vld [vmem:[%s6867_s9 + $0x40] ss:$28 sps:$4 sm:$0xff]   ;;  %v5575_v56 = vld [vmem:[%s6867_s9 + $0x12c] ss:$28 sps:$4 sm:$0xff]  }
 0x389   :  { %3531 = vmatpush1.bf16.msra.mxu1 %v5414_v48  ;;  %3562 = vmatprep.mubr.bf16.mxu1 %v2626_v53  ;;  %v5515_v48 = vld [vmem:[%s6867_s9 + $0x44] ss:$28 sps:$4 sm:$0xff]   ;;  %v5516_v53 = vld [vmem:[%s6867_s9 + $0x78] ss:$28 sps:$4 sm:$0xff]  }
 0x38a   :  { %3532 = vmatprep.subr.bf16.mxu1 %v5419_v52  ;;  %4357 = vmatprep.subr.bf16.mxu0 %v5512_v32  ;;  %v5518_v52 = vld [vmem:[%s6867_s9 + $0x7c] ss:$28 sps:$4 sm:$0xff]   ;;  %v5573_v32 = vld [vmem:[%s6867_s9 + $0x128] ss:$28 sps:$4 sm:$0xff]  }
 0x38d   :  { %3533 = vmatpush1.bf16.msra.mxu1 %v5417_v54  ;;  %v5521_v54 = vld [vmem:[%s6867_s9 + $0xb4] ss:$28 sps:$4 sm:$0xff]  }
 0x38e   :  { %3534 = vmatprep.subr.bf16.mxu1 %v5422_v55  ;;  %v5519_v55 = vld [vmem:[%s6867_s9 + $0xb0] ss:$28 sps:$4 sm:$0xff]  }
 0x391   :  { %3535 = vmatpush1.bf16.msra.mxu1 %v5420_v57  ;;  %v5524_v57 = vld [vmem:[%s6867_s9 + $0xec] ss:$28 sps:$4 sm:$0xff]  }
 0x392   :  { %3536 = vmatprep.subr.bf16.mxu1 %v5425_v58  ;;  %v5522_v58 = vld [vmem:[%s6867_s9 + $0xe8] ss:$28 sps:$4 sm:$0xff]  }
 0x395   :  { %3537 = vmatpush1.bf16.msra.mxu1 %v5423_v9  ;;  %v5527_v9 = vld [vmem:[%s6867_s9 + $0x124] ss:$28 sps:$4 sm:$0xff]  }
 0x396   :  { %3538 = vmatprep.subr.bf16.mxu1 %v5428_v60  ;;  %v5525_v60 = vld [vmem:[%s6867_s9 + $0x120] ss:$28 sps:$4 sm:$0xff]  }
 0x399   :  { %3539 = vmatpush1.bf16.msra.mxu1 %v5426_v34  ;;  %v5530_v34 = vld [vmem:[%s6867_s9 + $0x15c] ss:$28 sps:$4 sm:$0xff]  }
 0x39a   :  { %3540 = vmatprep.subr.bf16.mxu1 %v5431_v61  ;;  %v5528_v61 = vld [vmem:[%s6867_s9 + $0x158] ss:$28 sps:$4 sm:$0xff]  }
 0x39d   :  { %3541 = vmatpush1.bf16.msra.mxu1 %v5429_v62  ;;  %v5533_v62 = vld [vmem:[%s6867_s9 + $0x194] ss:$28 sps:$4 sm:$0xff]  }
 0x39e   :  { %3542 = vmatprep.subr.bf16.mxu1 %v5434_v63  ;;  %v5531_v63 = vld [vmem:[%s6867_s9 + $0x190] ss:$28 sps:$4 sm:$0xff]  }
 0x3a1   :  { %3543 = vmatpush1.bf16.msra.mxu1 %v5432_v0  ;;  %v5536_v0 = vld [vmem:[%s6867_s9 + $0x1cc] ss:$28 sps:$4 sm:$0xff]  }
 0x3a2   :  { %3544 = vmatprep.subr.bf16.mxu1 %v5437_v1  ;;  %v5534_v1 = vld [vmem:[%s6867_s9 + $0x1c8] ss:$28 sps:$4 sm:$0xff]  }
 0x3a5   :  { %3545 = vmatpush1.bf16.msra.mxu1 %v5435_v2  ;;  %v5539_v2 = vld [vmem:[%s6867_s9 + $0x204] ss:$28 sps:$4 sm:$0xff]  }
 0x3a6   :  { %3546 = vmatprep.subr.bf16.mxu1 %v5440_v3  ;;  %v5537_v3 = vld [vmem:[%s6867_s9 + $0x200] ss:$28 sps:$4 sm:$0xff]  }
 0x3a9   :  { %3547 = vmatpush1.bf16.msra.mxu1 %v5438_v4  ;;  %v5542_v4 = vld [vmem:[%s6867_s9 + $0x23c] ss:$28 sps:$4 sm:$0xff]  }
 0x3aa   :  { %3548 = vmatprep.subr.bf16.mxu1 %v5443_v5  ;;  %v5540_v5 = vld [vmem:[%s6867_s9 + $0x238] ss:$28 sps:$4 sm:$0xff]  }
 0x3ad   :  { %3549 = vmatpush1.bf16.msra.mxu1 %v5441_v10  ;;  %v5545_v10 = vld [vmem:[%s6867_s9 + $0x274] ss:$28 sps:$4 sm:$0xff]  }
 0x3ae   :  { %3550 = vmatprep.subr.bf16.mxu1 %v5446_v6  ;;  %v5543_v6 = vld [vmem:[%s6867_s9 + $0x270] ss:$28 sps:$4 sm:$0xff]  }
 0x3b1   :  { %3551 = vmatpush1.bf16.msra.mxu1 %v5444_v7  ;;  %v5548_v7 = vld [vmem:[%s6867_s9 + $0x2ac] ss:$28 sps:$4 sm:$0xff]  }
 0x3b2   :  { %3552 = vmatprep.subr.bf16.mxu1 %v5449_v8  ;;  %v5546_v8 = vld [vmem:[%s6867_s9 + $0x2a8] ss:$28 sps:$4 sm:$0xff]  }
 0x3b5   :  { %3553 = vmatpush1.bf16.msra.mxu1 %v5447_v11  ;;  %v5551_v11 = vld [vmem:[%s6867_s9 + $0x2e4] ss:$28 sps:$4 sm:$0xff]  }
 0x3b6   :  { %3554 = vmatprep.subr.bf16.mxu1 %v5452_v12  ;;  %v5549_v12 = vld [vmem:[%s6867_s9 + $0x2e0] ss:$28 sps:$4 sm:$0xff]  }
 0x3b9   :  { %3555 = vmatpush1.bf16.msra.mxu1 %v5450_v13  ;;  %v5554_v13 = vld [vmem:[%s6867_s9 + $0x31c] ss:$28 sps:$4 sm:$0xff]  }
 0x3ba   :  { %3556 = vmatprep.subr.bf16.mxu1 %v5455_v14  ;;  %v5552_v14 = vld [vmem:[%s6867_s9 + $0x318] ss:$28 sps:$4 sm:$0xff]  }
 0x3bd   :  { %3557 = vmatpush1.bf16.msra.mxu1 %v5453_v16  ;;  %v5557_v16 = vld [vmem:[%s6867_s9 + $0x354] ss:$28 sps:$4 sm:$0xff]  }
 0x3be   :  { %3558 = vmatprep.subr.bf16.mxu1 %v5458_v50  ;;  %v5560_v50 = vld [vmem:[%s6867_s9 + $0x14] ss:$28 sps:$4 sm:$0xff]  }
 0x3c1   :  { %3559 = vmatpush1.bf16.msra.mxu1 %v5456_v20  ;;  %v5558_v20 = vld [vmem:[%s6867_s9 + $0x10] ss:$28 sps:$4 sm:$0xff]  }
 0x3c2   :  { %3560 = vmatprep.subr.bf16.mxu1 %v5461_v22  ;;  %v5561_v22 = vld [vmem:[%s6867_s9 + $0x48] ss:$28 sps:$4 sm:$0xff]  }
 0x3c5   :  { %3561 = vmatpush1.bf16.msra.mxu1 %v5459_v23  ;;  %v5566_v23 = vld [vmem:[%s6867_s9 + $0x84] ss:$28 sps:$4 sm:$0xff]  }
 0x3c8   :  { %3563 = vmatmul.mubr.bf16.vlgmr.msra.gmra.mrb[12].mxu1 %v2625_v25  ;;  %v5569_v25 = vld [vmem:[%s6867_s9 + $0xbc] ss:$28 sps:$4 sm:$0xff]  }
 0x49b   :  { %v3564_v37 = vpop.f32.mrb[12].mxu1 }
 0x49c   :  { %v5115_v38 = vadd.f32 %v3564_v37, %v2760_v35  ;;  %v3566_v39 = vpop.f32.mrb[13].mxu1  ;;  %v5576_v35 = vld [vmem:[%s6867_s9 + $0x160] ss:$28 sps:$4 sm:$0xff]   ;;  %v5579_v37 = vld [vmem:[%s6867_s9 + $0x198] ss:$28 sps:$4 sm:$0xff]  }
 0x49d   :  { %v5116_v40 = vadd.f32 %v3566_v39, %v2764_v36  ;;  %v3568_v41 = vpop.f32.mrb[14].mxu1  ;;  %v5581_v36 = vld [vmem:[%s6867_s9 + $0x19c] ss:$28 sps:$4 sm:$0xff]   ;;  %v5582_v39 = vld [vmem:[%s6867_s9 + $0x1d0] ss:$28 sps:$4 sm:$0xff]  }
 0x49e   :  { %v3571_v42 = vmax.f32 %v5115_v38, 0.0  ;;  %v3569_v43 = vpop.f32.mrb[15].mxu1  ;;  %v5584_v38 = vld [vmem:[%s6867_s9 + $0x1d4] ss:$28 sps:$4 sm:$0xff]   ;;  %v5585_v41 = vld [vmem:[%s6867_s9 + $0x208] ss:$28 sps:$4 sm:$0xff]  }
 0x49f   :  { %v3572_v44 = vmax.f32 %v5116_v40, 0.0  ;;  %v5587_v40 = vld [vmem:[%s6867_s9 + $0x20c] ss:$28 sps:$4 sm:$0xff]   ;;  %v5588_v43 = vld [vmem:[%s6867_s9 + $0x240] ss:$28 sps:$4 sm:$0xff]  }
 0x4a0   :  { %v6589_v47 = vpack.c.bf16 %v3571_v42, %v3571_v42  ;;  %v5590_v42 = vld [vmem:[%s6867_s9 + $0x244] ss:$28 sps:$4 sm:$0xff]  }
 0x4a1   :  { %v6584_v45 = vpack.c.bf16 %v3572_v44, %v3572_v44  ;;  %v5593_v44 = vld [vmem:[%s6867_s9 + $0x27c] ss:$28 sps:$4 sm:$0xff]  }
 0x4a3   :  { %4348 = vmatprep.mubr.bf16.mxu0 %v6584_v45 }
 0x4a4   :  { %4349 = vmatmul.mubr.bf16.vlgmr.msra.gmra.mrb[16].mxu0 %v6589_v47 }
 0x4a5   :  { %4358 = vmatpush1.bf16.msra.mxu0 %v5510_v46  ;;  %4389 = vmatprep.mubr.bf16.mxu0 %v6584_v45  ;;  %v5591_v46 = vld [vmem:[%s6867_s9 + $0x278] ss:$28 sps:$4 sm:$0xff]  }
 0x4a6   :  { %4359 = vmatprep.subr.bf16.mxu0 %v5515_v48  ;;  %v5596_v48 = vld [vmem:[%s6867_s9 + $0x2b4] ss:$28 sps:$4 sm:$0xff]  }
 0x4a9   :  { %4360 = vmatpush1.bf16.msra.mxu0 %v5513_v49  ;;  %v5594_v49 = vld [vmem:[%s6867_s9 + $0x2b0] ss:$28 sps:$4 sm:$0xff]  }
 0x4aa   :  { %4361 = vmatprep.subr.bf16.mxu0 %v5518_v52  ;;  %v5599_v52 = vld [vmem:[%s6867_s9 + $0x2ec] ss:$28 sps:$4 sm:$0xff]  }
 0x4ad   :  { %4362 = vmatpush1.bf16.msra.mxu0 %v5516_v53  ;;  %v5597_v53 = vld [vmem:[%s6867_s9 + $0x2e8] ss:$28 sps:$4 sm:$0xff]  }
 0x4ae   :  { %4363 = vmatprep.subr.bf16.mxu0 %v5521_v54  ;;  %v5602_v54 = vld [vmem:[%s6867_s9 + $0x324] ss:$28 sps:$4 sm:$0xff]  }
 0x4b1   :  { %4364 = vmatpush1.bf16.msra.mxu0 %v5519_v55  ;;  %v5600_v55 = vld [vmem:[%s6867_s9 + $0x320] ss:$28 sps:$4 sm:$0xff]  }
 0x4b2   :  { %4365 = vmatprep.subr.bf16.mxu0 %v5524_v57  ;;  %v5605_v57 = vld [vmem:[%s6867_s9 + $0x35c] ss:$28 sps:$4 sm:$0xff]  }
 0x4b5   :  { %4366 = vmatpush1.bf16.msra.mxu0 %v5522_v58  ;;  %v5603_v58 = vld [vmem:[%s6867_s9 + $0x358] ss:$28 sps:$4 sm:$0xff]  }
 0x4b6   :  { %4367 = vmatprep.subr.bf16.mxu0 %v5527_v9  ;;  %v5606_v9 = vld [vmem:[%s6867_s9 + $0x1d8] ss:$28 sps:$4 sm:$0xff]  }
 0x4b9   :  { %4368 = vmatpush1.bf16.msra.mxu0 %v5525_v60  ;;  %v5607_v60 = vld [vmem:[%s6867_s9 + $0x18] ss:$28 sps:$4 sm:$0xff]  }
 0x4ba   :  { %4369 = vmatprep.subr.bf16.mxu0 %v5530_v34  ;;  %v5608_v34 = vld [vmem:[%s6867_s9 + $0x210] ss:$28 sps:$4 sm:$0xff]  }
 0x4bd   :  { %4370 = vmatpush1.bf16.msra.mxu0 %v5528_v61  ;;  %v5609_v61 = vld [vmem:[%s6867_s9 + $0x50] ss:$28 sps:$4 sm:$0xff]  }
 0x4be   :  { %4371 = vmatprep.subr.bf16.mxu0 %v5533_v62  ;;  %v5610_v62 = vld [vmem:[%s6867_s9 + $0x248] ss:$28 sps:$4 sm:$0xff]  }
 0x4c1   :  { %4372 = vmatpush1.bf16.msra.mxu0 %v5531_v63  ;;  %v5611_v63 = vld [vmem:[%s6867_s9 + $0x88] ss:$28 sps:$4 sm:$0xff]  }
 0x4c2   :  { %4373 = vmatprep.subr.bf16.mxu0 %v5536_v0  ;;  %v5612_v0 = vld [vmem:[%s6867_s9 + $0x280] ss:$28 sps:$4 sm:$0xff]  }
 0x4c5   :  { %4374 = vmatpush1.bf16.msra.mxu0 %v5534_v1  ;;  %v5614_v1 = vld [vmem:[%s6867_s9 + $0x2b8] ss:$28 sps:$4 sm:$0xff]  }
 0x4c6   :  { %4375 = vmatprep.subr.bf16.mxu0 %v5539_v2  ;;  %v5615_v2 = vld [vmem:[%s6867_s9 + $0xf8] ss:$28 sps:$4 sm:$0xff]  }
 0x4c9   :  { %4376 = vmatpush1.bf16.msra.mxu0 %v5537_v3  ;;  %v5616_v3 = vld [vmem:[%s6867_s9 + $0x2f0] ss:$28 sps:$4 sm:$0xff]  }
 0x4ca   :  { %4377 = vmatprep.subr.bf16.mxu0 %v5542_v4  ;;  %v5617_v4 = vld [vmem:[%s6867_s9 + $0x130] ss:$28 sps:$4 sm:$0xff]  }
 0x4cd   :  { %4378 = vmatpush1.bf16.msra.mxu0 %v5540_v5  ;;  %v5618_v5 = vld [vmem:[%s6867_s9 + $0x328] ss:$28 sps:$4 sm:$0xff]  }
 0x4ce   :  { %4379 = vmatprep.subr.bf16.mxu0 %v5545_v10  ;;  %v5619_v10 = vld [vmem:[%s6867_s9 + $0x168] ss:$28 sps:$4 sm:$0xff]  }
 0x4d1   :  { %4380 = vmatpush1.bf16.msra.mxu0 %v5543_v6  ;;  %v5620_v6 = vld [vmem:[%s6867_s9 + $0x360] ss:$28 sps:$4 sm:$0xff]  }
 0x4d2   :  { %4381 = vmatprep.subr.bf16.mxu0 %v5548_v7  ;;  %v5621_v7 = vld [vmem:[%s6867_s9 + $0x1a0] ss:$28 sps:$4 sm:$0xff]  }
 0x4d5   :  { %4382 = vmatpush1.bf16.msra.mxu0 %v5546_v8  ;;  %v3703_v8 = vld [vmem:[%s6868_s10] sm:$0x7f] }
 0x4d6   :  { %4383 = vmatprep.subr.bf16.mxu0 %v5551_v11  ;;  %v3708_v11 = vrot.slane %v3703_v8, %v6007_v29 }
 0x4d9   :  { %4384 = vmatpush1.bf16.msra.mxu0 %v5549_v12  ;;  %v3712_v12 = vrot.slane %v3703_v8, %v6013_v31 }
 0x4da   :  { %4385 = vmatprep.subr.bf16.mxu0 %v5554_v13 }
 0x4dd   :  { %4386 = vmatpush1.bf16.msra.mxu0 %v5552_v14 }
 0x4de   :  { %4387 = vmatprep.subr.bf16.mxu0 %v5557_v16 }
 0x4e1   :  { %4388 = vmatpush1.bf16.msra.mxu0 %v5555_v18 }
 0x4e2   :  { %4398 = vmatprep.subr.bf16.mxu0 %v5560_v50 }
 0x4e4   :  { %4390 = vmatmul.mubr.bf16.vlgmr.msra.gmra.mrb[20].mxu0 %v6589_v47 }
 0x4e5   :  { %4399 = vmatpush1.bf16.msra.mxu0 %v5558_v20  ;;  %4430 = vmatprep.mubr.bf16.mxu0 %v6584_v45 }
 0x4e6   :  { %4400 = vmatprep.subr.bf16.mxu0 %v5563_v21 }
 0x4e9   :  { %4401 = vmatpush1.bf16.msra.mxu0 %v5561_v22 }
 0x4ea   :  { %4402 = vmatprep.subr.bf16.mxu0 %v5566_v23  ;;  %v3720_v23 = vrot.slane %v3703_v8, %v6023_v51 }
 0x4ed   :  { %4403 = vmatpush1.bf16.msra.mxu0 %v5564_v24 }
 0x4ee   :  { %4404 = vmatprep.subr.bf16.mxu0 %v5569_v25 }
 0x4f1   :  { %4405 = vmatpush1.bf16.msra.mxu0 %v5567_v26 }
 0x4f2   :  { %4406 = vmatprep.subr.bf16.mxu0 %v5572_v27 }
 0x4f5   :  { %4407 = vmatpush1.bf16.msra.mxu0 %v5570_v30 }
 0x4f6   :  { %4408 = vmatprep.subr.bf16.mxu0 %v5575_v56 }
 0x4f9   :  { %4409 = vmatpush1.bf16.msra.mxu0 %v5573_v32  ;;  %v3724_v32 = vrot.slane %v3703_v8, %v981_v15 }
 0x4fa   :  { %4410 = vmatprep.subr.bf16.mxu0 %v5578_v33 }
 0x4fd   :  { %4411 = vmatpush1.bf16.msra.mxu0 %v5576_v35 }
 0x4fe   :  { %4412 = vmatprep.subr.bf16.mxu0 %v5581_v36 }
 0x501   :  { %4413 = vmatpush1.bf16.msra.mxu0 %v5579_v37 }
 0x502   :  { %4414 = vmatprep.subr.bf16.mxu0 %v5584_v38 }
 0x505   :  { %4415 = vmatpush1.bf16.msra.mxu0 %v5582_v39 }
 0x506   :  { %4416 = vmatprep.subr.bf16.mxu0 %v5587_v40 }
 0x509   :  { %4417 = vmatpush1.bf16.msra.mxu0 %v5585_v41 }
 0x50a   :  { %4418 = vmatprep.subr.bf16.mxu0 %v5590_v42  ;;  %v3732_v42 = vrot.slane %v3703_v8, %v989_v17 }
 0x50d   :  { %4419 = vmatpush1.bf16.msra.mxu0 %v5588_v43 }
 0x50e   :  { %4420 = vmatprep.subr.bf16.mxu0 %v5593_v44 }
 0x511   :  { %4421 = vmatpush1.bf16.msra.mxu0 %v5591_v46 }
 0x512   :  { %4422 = vmatprep.subr.bf16.mxu0 %v5596_v48 }
 0x515   :  { %4423 = vmatpush1.bf16.msra.mxu0 %v5594_v49 }
 0x516   :  { %4424 = vmatprep.subr.bf16.mxu0 %v5599_v52 }
 0x519   :  { %4425 = vmatpush1.bf16.msra.mxu0 %v5597_v53 }
 0x51a   :  { %4426 = vmatprep.subr.bf16.mxu0 %v5602_v54 }
 0x51d   :  { %4427 = vmatpush1.bf16.msra.mxu0 %v5600_v55 }
 0x51e   :  { %4428 = vmatprep.subr.bf16.mxu0 %v5605_v57 }
 0x521   :  { %4429 = vmatpush1.bf16.msra.mxu0 %v5603_v58 }
 0x522   :  { %5085 = vmatprep.subr.bf16.mxu0 %v5606_v9 }
 0x524   :  { %4431 = vmatmul.mubr.bf16.vlgmr.msra.gmra.mrb[24].mxu0 %v6589_v47 }
 0x525   :  { %5086 = vmatpush3.bf16.msra.mxu0 %v5607_v60  ;;  %4471 = vmatprep.mubr.bf16.mxu0 %v6584_v45  ;;  %v5613_v45 = vld [vmem:[%s6867_s9 + $0xc0] ss:$28 sps:$4 sm:$0xff]   ;;  %s5688_s9 = smov [#allocation5]  }
 0x526   :  { %5087 = vmatprep.subr.bf16.mxu0 %v5608_v34  ;;  %s4500_s10 = sshll.u32 %s5688_s9, 4  ;;  %s4501_s10 = int_to_ptr.vmem [resolvable:$true] %s4500_s10 }
 0x527   :  { %s5658_s30 = scalar_lea.vmem %s4501_s10, 896  ;;  %p5663_p9 = scmp.lt.s32.totalorder %s4501_s10, %s4501_s10 }
 0x528   :  { %p5659_p8 = scmp.ne.s32.totalorder %s4501_s10, %s5658_s30  ;;  %p5664_p10 = scmp.lt.s32.totalorder %s5658_s30, %s5658_s30 }
 0x529   :  { %5088 = vmatpush3.bf16.msra.mxu0 %v5609_v61 }
 0x52a   :  { %5089 = vmatprep.subr.bf16.mxu0 %v5610_v62  ;;  %p5665_p11 = por %p5664_p10, %p5663_p9 }
 0x52c   :  { %p5666_p12 = pnand %p5665_p11, %p5659_p8 }
 0x52d   :  { %5090 = vmatpush3.bf16.msra.mxu0 %v5611_v63 }
 0x52e   :  { %5091 = vmatprep.subr.bf16.mxu0 %v5612_v0 }
 0x531   :  { %5092 = vmatpush3.bf16.msra.mxu0 %v5613_v45 }
 0x532   :  { %5093 = vmatprep.subr.bf16.mxu0 %v5614_v1 }
 0x535   :  { %5094 = vmatpush3.bf16.msra.mxu0 %v5615_v2 }
 0x536   :  { %5095 = vmatprep.subr.bf16.mxu0 %v5616_v3 }
 0x539   :  { %5096 = vmatpush3.bf16.msra.mxu0 %v5617_v4 }
 0x53a   :  { %5097 = vmatprep.subr.bf16.mxu0 %v5618_v5 }
 0x53d   :  { %5098 = vmatpush3.bf16.msra.mxu0 %v5619_v10 }
 0x53e   :  { %5099 = vmatprep.subr.bf16.mxu0 %v5620_v6 }
 0x541   :  { %5100 = vmatpush3.bf16.msra.mxu0 %v5621_v7 }
 0x544   :  { %4472 = vmatmul.mubr.bf16.vlgmr.msra.gmra.mrb[28].mxu0 %v6589_v47  ;;  %v3716_v47 = vrot.slane %v3703_v8, %v6046_v59  ;;  %v3728_v59 = vrot.slane %v3703_v8, %v985_v19 }
 0x577   :  { %v4350_v13 = vpop.f32.mrb[16].mxu0 }
 0x578   :  { %v4351_v14 = vadd.f32 %v4350_v13, %v3708_v11  ;;  %v4352_v16 = vpop.f32.mrb[17].mxu0 }
 0x579   :  { %v4353_v18 = vadd.f32 %v4352_v16, %v3712_v12  ;;  %v4354_v50 = vpop.f32.mrb[18].mxu0 }
 0x57a   :  { %5622 = vtanh.f32 %v4351_v14  ;;  %v4355_v20 = vpop.f32.mrb[19].mxu0 }
 0x57b   :  { %5624 = vtanh.f32 %v4353_v18 }
 0x584   :  { %v5623_v21 = vpop.eup %5622 }
 0x585   :  { %v5625_v22 = vpop.eup %5624  ;;  %4486 = vst [vmem:[#allocation5] sm:$0xff] %v5623_v21 }
 0x586   :  { %4487 = vst [vmem:[#allocation5 + $0x8] sm:$0xff] %v5625_v22 }
 0x5b7   :  { %v4391_v24 = vpop.f32.mrb[20].mxu0 }
 0x5b8   :  { %v4392_v29 = vadd.f32 %v4391_v24, %v3716_v47  ;;  %v4393_v25 = vpop.f32.mrb[21].mxu0 }
 0x5b9   :  { %v4394_v31 = vadd.f32 %v4393_v25, %v3720_v23  ;;  %v4395_v26 = vpop.f32.mrb[22].mxu0 }
 0x5ba   :  { %5626 = vtanh.f32 %v4392_v29  ;;  %v4396_v27 = vpop.f32.mrb[23].mxu0 }
 0x5bb   :  { %5628 = vtanh.f32 %v4394_v31 }
 0x5c4   :  { %v5627_v30 = vpop.eup %5626 }
 0x5c5   :  { %v5629_v56 = vpop.eup %5628  ;;  %4488 = vst [vmem:[#allocation5 + $0x10] sm:$0xff] %v5627_v30 }
 0x5c6   :  { %4489 = vst [vmem:[#allocation5 + $0x18] sm:$0xff] %v5629_v56 }
 0x5f7   :  { %v4432_v33 = vpop.f32.mrb[24].mxu0 }
 0x5f8   :  { %v4433_v51 = vadd.f32 %v4432_v33, %v3724_v32  ;;  %v4434_v35 = vpop.f32.mrb[25].mxu0 }
 0x5f9   :  { %v4435_v36 = vadd.f32 %v4434_v35, %v3728_v59  ;;  %v4436_v37 = vpop.f32.mrb[26].mxu0 }
 0x5fa   :  { %5630 = vtanh.f32 %v4433_v51  ;;  %v4437_v38 = vpop.f32.mrb[27].mxu0 }
 0x5fb   :  { %5632 = vtanh.f32 %v4435_v36 }
 0x604   :  { %v5631_v39 = vpop.eup %5630 }
 0x605   :  { %v5633_v40 = vpop.eup %5632  ;;  %4490 = vst [vmem:[#allocation5 + $0x20] sm:$0xff] %v5631_v39 }
 0x606   :  { %4491 = vst [vmem:[#allocation5 + $0x28] sm:$0xff] %v5633_v40 }
 0x617   :  { %v5101_v41 = vpop.f32.mrb[28].mxu0 }
 0x618   :  { %v5102_v15 = vpop.f32.mrb[29].mxu0 }
 0x619   :  { %v5103_v43 = vadd.f32 %v5102_v15, %v5101_v41  ;;  %v5104_v44 = vpop.f32.mrb[30].mxu0 }
 0x61a   :  { %v5105_v19 = vpop.f32.mrb[31].mxu0 }
 0x61b   :  { %v4474_v46 = vadd.f32 %v5103_v43, %v3732_v42 }
 0x61d   :  { %5634 = vtanh.f32 %v4474_v46 }
 0x627   :  { %v5635_v48 = vpop.eup %5634 }
 0x628   :  { %4493 = vst.msk [vmem:[#allocation5 + $0x30] sm:$0xff] %vm4492_vm0, %v5635_v48 }
 0x629   :  { %5669 = shalt.err (!%p5666_p12)
}
 0x62a   :  { %s5670_s13 = scalar_lea.hbm %s6869_s11, 896 }
 0x62b   :  { %p5671_p13 = scmp.ne.s32.totalorder %s6869_s11, %s5670_s13  ;;  %p5674_p0 = scmp.lt.u32.totalorder %s5670_s13, %s6869_s11 }
 0x62d   :  { %p5676_p1 = pnand %p5674_p0, %p5671_p13 }
 0x62f   :  { %5679 = shalt.err (!%p5676_p1)
}
 0x630   :  { %4503 = dma.vmem_to_hbm [thread:$0]  %s4501_s10, 896, %s6869_s11, [#allocation4]  }
 0x631   :  { %5682 = dma.done.wait [#allocation4], 896  }
 0x632   :  { %5683 = vsyncadd [#allocation4], 4294966400 }
 0x633   :  { %4507 = vsyncpa [#allocation3], 1 }
 0x634   :  { %4508 = vsyncpa [#allocation4], 1 }

</bundles_post_ra>
